<compile_context>
chip_gen: v7x
topology: tpu7x:2x2x1
jax: 0.10.0
libtpu: 0.0.40
codegen_flags: <defaults>
</compile_context>

<pallas_src>
import math

import jax
import jax.numpy as jnp
from jax.experimental import pallas as pl
from jax.experimental.pallas import tpu as pltpu


_LANE = 128
_TS_CAP = 131072                 # 128K lanes: ~5.8 MB f32 in+out per step,
                                 # ~11.5 MB double-buffered (all generations).
_VMEM_LIMIT = 32 * 1024 * 1024   # > v5e 16 MiB default scoped, <= v7x physical.
_FUSED_MAX_PIXELS = 128 * 128    # whole-image-per-step path, no register spill.


def _ceil_div(a, b):
    return -(-a // b)


def _round_up(x, m):
    return ((x + m - 1) // m) * m


# ----------------------------------------------------------------------------
# Kernels
# ----------------------------------------------------------------------------
def _conv1x1_pad_fused_kernel(x_ref, wb_ref, o_ref):
    # x_ref : (Cin, H, W)       VMEM  (unpadded input image, one batch)
    # wb_ref: (Cout, Cin + 1)   SMEM  ([weights | bias + other] scalars)
    # o_ref : (Cout, H+2, W+2)  VMEM  (padded output image, one batch)
    cin, h, w = x_ref.shape
    cout, hp, wp = o_ref.shape
    for co in range(cout):                       # static unroll (Cout == 8)
        b_co = wb_ref[co, cin]                   # bias[co] + other
        # Border pixels only see the zero pad -> bias + other everywhere;
        # the interior is overwritten just below (VMEM stores are cheap).
        o_ref[co, :, :] = jnp.full((hp, wp), b_co, dtype=jnp.float32)
        acc = jnp.full((h, w), b_co, dtype=jnp.float32)
        for ci in range(cin):                    # static unroll (Cin == 3)
            acc = acc + wb_ref[co, ci] * x_ref[ci, :, :]
        o_ref[co, 1:1 + h, 1:1 + w] = acc        # interior, offset-(1,1) store


def _conv1x1_flat_kernel(x_ref, wb_ref, o_ref):
    # x_ref : (Cin, TS)       VMEM  (zero-padded image, spatial flattened)
    # wb_ref: (Cout, Cin + 1) VMEM  ([weights | bias + other], resident)
    # o_ref : (Cout, TS)      VMEM
    cin = x_ref.shape[0]
    x = x_ref[...]
    wb = wb_ref[...]
    # Fold the (bias + other) addend into the first tap: Cin broadcast FMAs
    # per output vreg on the VPU.  (If VALU ever becomes the binding slot, a
    # stride-0 sublane-broadcast load x_ref[pl.ds(ci, Cout, stride=0), :]
    # would move the (1,TS)->(Cout,TS) broadcast into the load slots.)
    out = wb[:, 0:1] * x[0:1, :] + wb[:, cin:cin + 1]
    for ci in range(1, cin):
        out = out + wb[:, ci:ci + 1] * x[ci:ci + 1, :]
    o_ref[...] = out


# ----------------------------------------------------------------------------
# Wrappers
# ----------------------------------------------------------------------------
def _conv_fused(x32, wb, cout, hp, wp):
    n, cin, h, w = x32.shape
    return pl.pallas_call(
        _conv1x1_pad_fused_kernel,
        out_shape=jax.ShapeDtypeStruct((n, cout, hp, wp), jnp.float32),
        grid=(n,),
        in_specs=[
            pl.BlockSpec((None, cin, h, w), lambda b: (b, 0, 0, 0)),
            pl.BlockSpec(memory_space=pltpu.MemorySpace.SMEM),
        ],
        out_specs=pl.BlockSpec((None, cout, hp, wp), lambda b: (b, 0, 0, 0)),
        compiler_params=pltpu.CompilerParams(
            dimension_semantics=("parallel",),
            vmem_limit_bytes=_VMEM_LIMIT),
        cost_estimate=pl.CostEstimate(
            flops=2 * n * h * w * cin * cout,
            transcendentals=0,
            bytes_accessed=4 * n * (cin * h * w + cout * hp * wp)),
    )(x32, wb)


def _conv_flat(x32, wb, cout, hp, wp):
    n, cin, h, w = x32.shape
    mp = hp * wp
    # Zero-pad spatially on the host, flatten padded HxW onto the lane axis.
    # No NCHW<->NHWC transposes anywhere.  (Extra HBM pass; the fused path
    # above avoids it for images small enough for whole-image blocks.)
    x_flat = jnp.pad(x32, ((0, 0), (0, 0), (1, 1), (1, 1))).reshape(n, cin, mp)

    # Tile sizing: as large as VMEM comfortably allows so per-step DMA time
    # dominates the ~0.35us pipeline overhead.  Only force >= 2 spatial tiles
    # when batch alone would give a single grid step (keeps both v7x TCs busy).
    if n >= 2:
        ts = min(_round_up(mp, _LANE), _TS_CAP)
    else:
        ts = min(_round_up(_ceil_div(mp, 2), _LANE), _TS_CAP)
    ts = max(ts, _LANE)
    num_tiles = _ceil_div(mp, ts)

    out_flat = pl.pallas_call(
        _conv1x1_flat_kernel,
        out_shape=jax.ShapeDtypeStruct((n, cout, mp), jnp.float32),
        grid=(n, num_tiles),
        in_specs=[
            pl.BlockSpec((None, cin, ts), lambda b, j: (b, 0, j)),
            pl.BlockSpec((cout, cin + 1), lambda b, j: (0, 0)),
        ],
        out_specs=pl.BlockSpec((None, cout, ts), lambda b, j: (b, 0, j)),
        compiler_params=pltpu.CompilerParams(
            dimension_semantics=("parallel", "parallel"),
            vmem_limit_bytes=_VMEM_LIMIT),
        cost_estimate=pl.CostEstimate(
            flops=2 * n * mp * cin * cout,
            transcendentals=0,
            bytes_accessed=4 * n * mp * (cin + cout)),
    )(x_flat, wb)
    # NOTE: the last spatial tile may extend past mp; those out-of-range
    # output lanes are dropped on writeback (blocked-spec masking), which is
    # what keeps the partial tile correct.
    return out_flat.reshape(n, cout, hp, wp)


def conv1x1_pad1_add(x_nchw, weight, bias, other_scalar=1.0, use_fused=True):
    """1x1 conv (stride 1, padding 1) + scalar `other`.

    x_nchw: (N, Cin, H, W) f32.  weight: (Cout, Cin) or PyTorch-style
    (Cout, Cin, 1, 1).  bias: (Cout,).
    """
    n, cin, h, w = x_nchw.shape
    weight = jnp.asarray(weight, jnp.float32).reshape(weight.shape[0], -1)
    cout = weight.shape[0]
    assert weight.shape == (cout, cin), weight.shape
    hp, wp = h + 2, w + 2

    x32 = x_nchw.astype(jnp.float32)
    # Single resident constant: [weights | bias + other]  -> (Cout, Cin + 1).
    addend = (jnp.asarray(bias, jnp.float32)
              + jnp.float32(other_scalar)).reshape(cout, 1)
    wb = jnp.concatenate([weight, addend], axis=1)

    if use_fused and h * w <= _FUSED_MAX_PIXELS:
        try:
            return _conv_fused(x32, wb, cout, hp, wp)
        except Exception:
            # Safety net: if the offset-(1,1) interior store is rejected by
            # the local Mosaic build, fall back to the host-padded flat path
            # (slower, still correct).
            pass
    return _conv_flat(x32, wb, cout, hp, wp)


def reference(x_nchw, weight, bias, other_scalar):
    # Pure-JAX reference: 1x1 conv with padding=1 == channel matmul on the
    # zero-padded image.
    x_pad = jnp.pad(x_nchw, ((0, 0), (0, 0), (1, 1), (1, 1)))
    y = jnp.einsum("nchw,oc->nohw", x_pad, weight) + bias[None, :, None, None]
    return y + other_scalar


if __name__ == "__main__":
    key = jax.random.PRNGKey(0)
    k_x, k_w, k_b = jax.random.split(key, 3)

    # Shapes from the module spec: x1 = torch.randn(1, 3, 64, 64).
    N, CIN, H, W = 1, 3, 64, 64
    COUT = 8

    x = jax.random.normal(k_x, (N, CIN, H, W), dtype=jnp.float32)

    # Conv2d parameters stored PyTorch-style as (Cout, Cin, 1, 1).
    bound = 1.0 / math.sqrt(CIN)
    weight = jax.random.uniform(k_w, (COUT, CIN, 1, 1), jnp.float32,
                                -bound, bound)
    bias = jax.random.uniform(k_b, (COUT,), jnp.float32, -bound, bound)

    ref = reference(x, weight.reshape(COUT, CIN), bias, 1.0)

    # Primary (pad-fused) path.
    out = jax.block_until_ready(conv1x1_pad1_add(x, weight, bias, 1.0))
    assert out.shape == (N, COUT, H + 2, W + 2), out.shape
    assert jnp.allclose(out, ref, atol=1e-5, rtol=1e-5), float(
        jnp.max(jnp.abs(out - ref)))

    # Flat (host-padded, big-tile) path used for large images.
    out2 = jax.block_until_ready(
        conv1x1_pad1_add(x, weight, bias, 1.0, use_fused=False))
    assert jnp.allclose(out2, ref, atol=1e-5, rtol=1e-5), float(
        jnp.max(jnp.abs(out2 - ref)))

    print("KERNEL_OK")
</pallas_src>

<mosaic_0001>
module attributes {stable_mosaic.version = 11 : i64} {
  func.func @_conv1x1_pad_fused_kernel(%arg0: i32, %arg1: memref<1x3x64x64xf32, #tpu.memory_space<vmem>>, %arg2: memref<8x4xf32, #tpu.memory_space<smem>>, %arg3: memref<1x8x66x66xf32, #tpu.memory_space<vmem>>) attributes {dimension_semantics = [#tpu.dimension_semantics<parallel>], iteration_bounds = array<i64: 1>, scalar_prefetch = 0 : i64, scratch_operands = 0 : i64, tpu.core_type = #tpu.core_type<tc>, window_params = [{transform_indices = @transform_0, window_bounds = array<i64: 1, 3, 64, 64>}, {transform_indices = @transform_1, window_bounds = array<i64: 8, 4>}, {transform_indices = @transform_2, window_bounds = array<i64: 1, 8, 66, 66>}]} {
    %c0 = arith.constant 0 : index
    %c3 = arith.constant 3 : index
    %0 = memref.load %arg2[%c0, %c3] : memref<8x4xf32, #tpu.memory_space<smem>>
    %1 = vector.broadcast %0 : f32 to vector<66x66xf32>
    %c0_0 = arith.constant 0 : index
    %c0_1 = arith.constant 0 : index
    %c0_2 = arith.constant 0 : index
    %c0_3 = arith.constant 0 : index
    %2 = vector.load %arg3[%c0_0, %c0_1, %c0_2, %c0_3] : memref<1x8x66x66xf32, #tpu.memory_space<vmem>>, vector<1x1x66x66xf32>
    %3 = vector.shape_cast %2 : vector<1x1x66x66xf32> to vector<66x66xf32>
    %4 = vector.shape_cast %1 : vector<66x66xf32> to vector<1x1x66x66xf32>
    tpu.vector_store %arg3[%c0_0, %c0_1, %c0_2, %c0_3], %4 {strides = array<i32>} : memref<1x8x66x66xf32, #tpu.memory_space<vmem>>, vector<1x1x66x66xf32>,
    %5 = vector.broadcast %0 : f32 to vector<64x64xf32>
    %c0_4 = arith.constant 0 : index
    %c0_5 = arith.constant 0 : index
    %6 = memref.load %arg2[%c0_4, %c0_5] : memref<8x4xf32, #tpu.memory_space<smem>>
    %c0_6 = arith.constant 0 : index
    %c0_7 = arith.constant 0 : index
    %c0_8 = arith.constant 0 : index
    %c0_9 = arith.constant 0 : index
    %7 = vector.load %arg1[%c0_6, %c0_7, %c0_8, %c0_9] : memref<1x3x64x64xf32, #tpu.memory_space<vmem>>, vector<1x1x64x64xf32>
    %8 = vector.shape_cast %7 : vector<1x1x64x64xf32> to vector<64x64xf32>
    %9 = vector.broadcast %6 : f32 to vector<64x64xf32>
    %10 = arith.mulf %9, %8 : vector<64x64xf32>
    %11 = arith.addf %5, %10 : vector<64x64xf32>
    %c0_10 = arith.constant 0 : index
    %c1 = arith.constant 1 : index
    %12 = memref.load %arg2[%c0_10, %c1] : memref<8x4xf32, #tpu.memory_space<smem>>
    %c0_11 = arith.constant 0 : index
    %c1_12 = arith.constant 1 : index
    %c0_13 = arith.constant 0 : index
    %c0_14 = arith.constant 0 : index
    %13 = vector.load %arg1[%c0_11, %c1_12, %c0_13, %c0_14] : memref<1x3x64x64xf32, #tpu.memory_space<vmem>>, vector<1x1x64x64xf32>
    %14 = vector.shape_cast %13 : vector<1x1x64x64xf32> to vector<64x64xf32>
    %15 = vector.broadcast %12 : f32 to vector<64x64xf32>
    %16 = arith.mulf %15, %14 : vector<64x64xf32>
    %17 = arith.addf %11, %16 : vector<64x64xf32>
    %c0_15 = arith.constant 0 : index
    %c2 = arith.constant 2 : index
    %18 = memref.load %arg2[%c0_15, %c2] : memref<8x4xf32, #tpu.memory_space<smem>>
    %c0_16 = arith.constant 0 : index
    %c2_17 = arith.constant 2 : index
    %c0_18 = arith.constant 0 : index
    %c0_19 = arith.constant 0 : index
    %19 = vector.load %arg1[%c0_16, %c2_17, %c0_18, %c0_19] : memref<1x3x64x64xf32, #tpu.memory_space<vmem>>, vector<1x1x64x64xf32>
    %20 = vector.shape_cast %19 : vector<1x1x64x64xf32> to vector<64x64xf32>
    %21 = vector.broadcast %18 : f32 to vector<64x64xf32>
    %22 = arith.mulf %21, %20 : vector<64x64xf32>
    %23 = arith.addf %17, %22 : vector<64x64xf32>
    %c0_20 = arith.constant 0 : index
    %c0_21 = arith.constant 0 : index
    %c1_22 = arith.constant 1 : index
    %c1_23 = arith.constant 1 : index
    %24 = vector.load %arg3[%c0_20, %c0_21, %c1_22, %c1_23] : memref<1x8x66x66xf32, #tpu.memory_space<vmem>>, vector<1x1x64x64xf32>
    %25 = vector.shape_cast %24 : vector<1x1x64x64xf32> to vector<64x64xf32>
    %26 = vector.shape_cast %23 : vector<64x64xf32> to vector<1x1x64x64xf32>
    tpu.vector_store %arg3[%c0_20, %c0_21, %c1_22, %c1_23], %26 {strides = array<i32>} : memref<1x8x66x66xf32, #tpu.memory_space<vmem>>, vector<1x1x64x64xf32>,
    %c1_24 = arith.constant 1 : index
    %c3_25 = arith.constant 3 : index
    %27 = memref.load %arg2[%c1_24, %c3_25] : memref<8x4xf32, #tpu.memory_space<smem>>
    %28 = vector.broadcast %27 : f32 to vector<66x66xf32>
    %c0_26 = arith.constant 0 : index
    %c1_27 = arith.constant 1 : index
    %c0_28 = arith.constant 0 : index
    %c0_29 = arith.constant 0 : index
    %29 = vector.load %arg3[%c0_26, %c1_27, %c0_28, %c0_29] : memref<1x8x66x66xf32, #tpu.memory_space<vmem>>, vector<1x1x66x66xf32>
    %30 = vector.shape_cast %29 : vector<1x1x66x66xf32> to vector<66x66xf32>
    %31 = vector.shape_cast %28 : vector<66x66xf32> to vector<1x1x66x66xf32>
    tpu.vector_store %arg3[%c0_26, %c1_27, %c0_28, %c0_29], %31 {strides = array<i32>} : memref<1x8x66x66xf32, #tpu.memory_space<vmem>>, vector<1x1x66x66xf32>,
    %32 = vector.broadcast %27 : f32 to vector<64x64xf32>
    %c1_30 = arith.constant 1 : index
    %c0_31 = arith.constant 0 : index
    %33 = memref.load %arg2[%c1_30, %c0_31] : memref<8x4xf32, #tpu.memory_space<smem>>
    %c0_32 = arith.constant 0 : index
    %c0_33 = arith.constant 0 : index
    %c0_34 = arith.constant 0 : index
    %c0_35 = arith.constant 0 : index
    %34 = vector.load %arg1[%c0_32, %c0_33, %c0_34, %c0_35] : memref<1x3x64x64xf32, #tpu.memory_space<vmem>>, vector<1x1x64x64xf32>
    %35 = vector.shape_cast %34 : vector<1x1x64x64xf32> to vector<64x64xf32>
    %36 = vector.broadcast %33 : f32 to vector<64x64xf32>
    %37 = arith.mulf %36, %35 : vector<64x64xf32>
    %38 = arith.addf %32, %37 : vector<64x64xf32>
    %c1_36 = arith.constant 1 : index
    %c1_37 = arith.constant 1 : index
    %39 = memref.load %arg2[%c1_36, %c1_37] : memref<8x4xf32, #tpu.memory_space<smem>>
    %c0_38 = arith.constant 0 : index
    %c1_39 = arith.constant 1 : index
    %c0_40 = arith.constant 0 : index
    %c0_41 = arith.constant 0 : index
    %40 = vector.load %arg1[%c0_38, %c1_39, %c0_40, %c0_41] : memref<1x3x64x64xf32, #tpu.memory_space<vmem>>, vector<1x1x64x64xf32>
    %41 = vector.shape_cast %40 : vector<1x1x64x64xf32> to vector<64x64xf32>
    %42 = vector.broadcast %39 : f32 to vector<64x64xf32>
    %43 = arith.mulf %42, %41 : vector<64x64xf32>
    %44 = arith.addf %38, %43 : vector<64x64xf32>
    %c1_42 = arith.constant 1 : index
    %c2_43 = arith.constant 2 : index
    %45 = memref.load %arg2[%c1_42, %c2_43] : memref<8x4xf32, #tpu.memory_space<smem>>
    %c0_44 = arith.constant 0 : index
    %c2_45 = arith.constant 2 : index
    %c0_46 = arith.constant 0 : index
    %c0_47 = arith.constant 0 : index
    %46 = vector.load %arg1[%c0_44, %c2_45, %c0_46, %c0_47] : memref<1x3x64x64xf32, #tpu.memory_space<vmem>>, vector<1x1x64x64xf32>
    %47 = vector.shape_cast %46 : vector<1x1x64x64xf32> to vector<64x64xf32>
    %48 = vector.broadcast %45 : f32 to vector<64x64xf32>
    %49 = arith.mulf %48, %47 : vector<64x64xf32>
    %50 = arith.addf %44, %49 : vector<64x64xf32>
    %c0_48 = arith.constant 0 : index
    %c1_49 = arith.constant 1 : index
    %c1_50 = arith.constant 1 : index
    %c1_51 = arith.constant 1 : index
    %51 = vector.load %arg3[%c0_48, %c1_49, %c1_50, %c1_51] : memref<1x8x66x66xf32, #tpu.memory_space<vmem>>, vector<1x1x64x64xf32>
    %52 = vector.shape_cast %51 : vector<1x1x64x64xf32> to vector<64x64xf32>
    %53 = vector.shape_cast %50 : vector<64x64xf32> to vector<1x1x64x64xf32>
    tpu.vector_store %arg3[%c0_48, %c1_49, %c1_50, %c1_51], %53 {strides = array<i32>} : memref<1x8x66x66xf32, #tpu.memory_space<vmem>>, vector<1x1x64x64xf32>,
    %c2_52 = arith.constant 2 : index
    %c3_53 = arith.constant 3 : index
    %54 = memref.load %arg2[%c2_52, %c3_53] : memref<8x4xf32, #tpu.memory_space<smem>>
    %55 = vector.broadcast %54 : f32 to vector<66x66xf32>
    %c0_54 = arith.constant 0 : index
    %c2_55 = arith.constant 2 : index
    %c0_56 = arith.constant 0 : index
    %c0_57 = arith.constant 0 : index
    %56 = vector.load %arg3[%c0_54, %c2_55, %c0_56, %c0_57] : memref<1x8x66x66xf32, #tpu.memory_space<vmem>>, vector<1x1x66x66xf32>
    %57 = vector.shape_cast %56 : vector<1x1x66x66xf32> to vector<66x66xf32>
    %58 = vector.shape_cast %55 : vector<66x66xf32> to vector<1x1x66x66xf32>
    tpu.vector_store %arg3[%c0_54, %c2_55, %c0_56, %c0_57], %58 {strides = array<i32>} : memref<1x8x66x66xf32, #tpu.memory_space<vmem>>, vector<1x1x66x66xf32>,
    %59 = vector.broadcast %54 : f32 to vector<64x64xf32>
    %c2_58 = arith.constant 2 : index
    %c0_59 = arith.constant 0 : index
    %60 = memref.load %arg2[%c2_58, %c0_59] : memref<8x4xf32, #tpu.memory_space<smem>>
    %c0_60 = arith.constant 0 : index
    %c0_61 = arith.constant 0 : index
    %c0_62 = arith.constant 0 : index
    %c0_63 = arith.constant 0 : index
    %61 = vector.load %arg1[%c0_60, %c0_61, %c0_62, %c0_63] : memref<1x3x64x64xf32, #tpu.memory_space<vmem>>, vector<1x1x64x64xf32>
    %62 = vector.shape_cast %61 : vector<1x1x64x64xf32> to vector<64x64xf32>
    %63 = vector.broadcast %60 : f32 to vector<64x64xf32>
    %64 = arith.mulf %63, %62 : vector<64x64xf32>
    %65 = arith.addf %59, %64 : vector<64x64xf32>
    %c2_64 = arith.constant 2 : index
    %c1_65 = arith.constant 1 : index
    %66 = memref.load %arg2[%c2_64, %c1_65] : memref<8x4xf32, #tpu.memory_space<smem>>
    %c0_66 = arith.constant 0 : index
    %c1_67 = arith.constant 1 : index
    %c0_68 = arith.constant 0 : index
    %c0_69 = arith.constant 0 : index
    %67 = vector.load %arg1[%c0_66, %c1_67, %c0_68, %c0_69] : memref<1x3x64x64xf32, #tpu.memory_space<vmem>>, vector<1x1x64x64xf32>
    %68 = vector.shape_cast %67 : vector<1x1x64x64xf32> to vector<64x64xf32>
    %69 = vector.broadcast %66 : f32 to vector<64x64xf32>
    %70 = arith.mulf %69, %68 : vector<64x64xf32>
    %71 = arith.addf %65, %70 : vector<64x64xf32>
    %c2_70 = arith.constant 2 : index
    %c2_71 = arith.constant 2 : index
    %72 = memref.load %arg2[%c2_70, %c2_71] : memref<8x4xf32, #tpu.memory_space<smem>>
    %c0_72 = arith.constant 0 : index
    %c2_73 = arith.constant 2 : index
    %c0_74 = arith.constant 0 : index
    %c0_75 = arith.constant 0 : index
    %73 = vector.load %arg1[%c0_72, %c2_73, %c0_74, %c0_75] : memref<1x3x64x64xf32, #tpu.memory_space<vmem>>, vector<1x1x64x64xf32>
    %74 = vector.shape_cast %73 : vector<1x1x64x64xf32> to vector<64x64xf32>
    %75 = vector.broadcast %72 : f32 to vector<64x64xf32>
    %76 = arith.mulf %75, %74 : vector<64x64xf32>
    %77 = arith.addf %71, %76 : vector<64x64xf32>
    %c0_76 = arith.constant 0 : index
    %c2_77 = arith.constant 2 : index
    %c1_78 = arith.constant 1 : index
    %c1_79 = arith.constant 1 : index
    %78 = vector.load %arg3[%c0_76, %c2_77, %c1_78, %c1_79] : memref<1x8x66x66xf32, #tpu.memory_space<vmem>>, vector<1x1x64x64xf32>
    %79 = vector.shape_cast %78 : vector<1x1x64x64xf32> to vector<64x64xf32>
    %80 = vector.shape_cast %77 : vector<64x64xf32> to vector<1x1x64x64xf32>
    tpu.vector_store %arg3[%c0_76, %c2_77, %c1_78, %c1_79], %80 {strides = array<i32>} : memref<1x8x66x66xf32, #tpu.memory_space<vmem>>, vector<1x1x64x64xf32>,
    %c3_80 = arith.constant 3 : index
    %c3_81 = arith.constant 3 : index
    %81 = memref.load %arg2[%c3_80, %c3_81] : memref<8x4xf32, #tpu.memory_space<smem>>
    %82 = vector.broadcast %81 : f32 to vector<66x66xf32>
    %c0_82 = arith.constant 0 : index
    %c3_83 = arith.constant 3 : index
    %c0_84 = arith.constant 0 : index
    %c0_85 = arith.constant 0 : index
    %83 = vector.load %arg3[%c0_82, %c3_83, %c0_84, %c0_85] : memref<1x8x66x66xf32, #tpu.memory_space<vmem>>, vector<1x1x66x66xf32>
    %84 = vector.shape_cast %83 : vector<1x1x66x66xf32> to vector<66x66xf32>
    %85 = vector.shape_cast %82 : vector<66x66xf32> to vector<1x1x66x66xf32>
    tpu.vector_store %arg3[%c0_82, %c3_83, %c0_84, %c0_85], %85 {strides = array<i32>} : memref<1x8x66x66xf32, #tpu.memory_space<vmem>>, vector<1x1x66x66xf32>,
    %86 = vector.broadcast %81 : f32 to vector<64x64xf32>
    %c3_86 = arith.constant 3 : index
    %c0_87 = arith.constant 0 : index
    %87 = memref.load %arg2[%c3_86, %c0_87] : memref<8x4xf32, #tpu.memory_space<smem>>
    %c0_88 = arith.constant 0 : index
    %c0_89 = arith.constant 0 : index
    %c0_90 = arith.constant 0 : index
    %c0_91 = arith.constant 0 : index
    %88 = vector.load %arg1[%c0_88, %c0_89, %c0_90, %c0_91] : memref<1x3x64x64xf32, #tpu.memory_space<vmem>>, vector<1x1x64x64xf32>
    %89 = vector.shape_cast %88 : vector<1x1x64x64xf32> to vector<64x64xf32>
    %90 = vector.broadcast %87 : f32 to vector<64x64xf32>
    %91 = arith.mulf %90, %89 : vector<64x64xf32>
    %92 = arith.addf %86, %91 : vector<64x64xf32>
    %c3_92 = arith.constant 3 : index
    %c1_93 = arith.constant 1 : index
    %93 = memref.load %arg2[%c3_92, %c1_93] : memref<8x4xf32, #tpu.memory_space<smem>>
    %c0_94 = arith.constant 0 : index
    %c1_95 = arith.constant 1 : index
    %c0_96 = arith.constant 0 : index
    %c0_97 = arith.constant 0 : index
    %94 = vector.load %arg1[%c0_94, %c1_95, %c0_96, %c0_97] : memref<1x3x64x64xf32, #tpu.memory_space<vmem>>, vector<1x1x64x64xf32>
    %95 = vector.shape_cast %94 : vector<1x1x64x64xf32> to vector<64x64xf32>
    %96 = vector.broadcast %93 : f32 to vector<64x64xf32>
    %97 = arith.mulf %96, %95 : vector<64x64xf32>
    %98 = arith.addf %92, %97 : vector<64x64xf32>
    %c3_98 = arith.constant 3 : index
    %c2_99 = arith.constant 2 : index
    %99 = memref.load %arg2[%c3_98, %c2_99] : memref<8x4xf32, #tpu.memory_space<smem>>
    %c0_100 = arith.constant 0 : index
    %c2_101 = arith.constant 2 : index
    %c0_102 = arith.constant 0 : index
    %c0_103 = arith.constant 0 : index
    %100 = vector.load %arg1[%c0_100, %c2_101, %c0_102, %c0_103] : memref<1x3x64x64xf32, #tpu.memory_space<vmem>>, vector<1x1x64x64xf32>
    %101 = vector.shape_cast %100 : vector<1x1x64x64xf32> to vector<64x64xf32>
    %102 = vector.broadcast %99 : f32 to vector<64x64xf32>
    %103 = arith.mulf %102, %101 : vector<64x64xf32>
    %104 = arith.addf %98, %103 : vector<64x64xf32>
    %c0_104 = arith.constant 0 : index
    %c3_105 = arith.constant 3 : index
    %c1_106 = arith.constant 1 : index
    %c1_107 = arith.constant 1 : index
    %105 = vector.load %arg3[%c0_104, %c3_105, %c1_106, %c1_107] : memref<1x8x66x66xf32, #tpu.memory_space<vmem>>, vector<1x1x64x64xf32>
    %106 = vector.shape_cast %105 : vector<1x1x64x64xf32> to vector<64x64xf32>
    %107 = vector.shape_cast %104 : vector<64x64xf32> to vector<1x1x64x64xf32>
    tpu.vector_store %arg3[%c0_104, %c3_105, %c1_106, %c1_107], %107 {strides = array<i32>} : memref<1x8x66x66xf32, #tpu.memory_space<vmem>>, vector<1x1x64x64xf32>,
    %c4 = arith.constant 4 : index
    %c3_108 = arith.constant 3 : index
    %108 = memref.load %arg2[%c4, %c3_108] : memref<8x4xf32, #tpu.memory_space<smem>>
    %109 = vector.broadcast %108 : f32 to vector<66x66xf32>
    %c0_109 = arith.constant 0 : index
    %c4_110 = arith.constant 4 : index
    %c0_111 = arith.constant 0 : index
    %c0_112 = arith.constant 0 : index
    %110 = vector.load %arg3[%c0_109, %c4_110, %c0_111, %c0_112] : memref<1x8x66x66xf32, #tpu.memory_space<vmem>>, vector<1x1x66x66xf32>
    %111 = vector.shape_cast %110 : vector<1x1x66x66xf32> to vector<66x66xf32>
    %112 = vector.shape_cast %109 : vector<66x66xf32> to vector<1x1x66x66xf32>
    tpu.vector_store %arg3[%c0_109, %c4_110, %c0_111, %c0_112], %112 {strides = array<i32>} : memref<1x8x66x66xf32, #tpu.memory_space<vmem>>, vector<1x1x66x66xf32>,
    %113 = vector.broadcast %108 : f32 to vector<64x64xf32>
    %c4_113 = arith.constant 4 : index
    %c0_114 = arith.constant 0 : index
    %114 = memref.load %arg2[%c4_113, %c0_114] : memref<8x4xf32, #tpu.memory_space<smem>>
    %c0_115 = arith.constant 0 : index
    %c0_116 = arith.constant 0 : index
    %c0_117 = arith.constant 0 : index
    %c0_118 = arith.constant 0 : index
    %115 = vector.load %arg1[%c0_115, %c0_116, %c0_117, %c0_118] : memref<1x3x64x64xf32, #tpu.memory_space<vmem>>, vector<1x1x64x64xf32>
    %116 = vector.shape_cast %115 : vector<1x1x64x64xf32> to vector<64x64xf32>
    %117 = vector.broadcast %114 : f32 to vector<64x64xf32>
    %118 = arith.mulf %117, %116 : vector<64x64xf32>
    %119 = arith.addf %113, %118 : vector<64x64xf32>
    %c4_119 = arith.constant 4 : index
    %c1_120 = arith.constant 1 : index
    %120 = memref.load %arg2[%c4_119, %c1_120] : memref<8x4xf32, #tpu.memory_space<smem>>
    %c0_121 = arith.constant 0 : index
    %c1_122 = arith.constant 1 : index
    %c0_123 = arith.constant 0 : index
    %c0_124 = arith.constant 0 : index
    %121 = vector.load %arg1[%c0_121, %c1_122, %c0_123, %c0_124] : memref<1x3x64x64xf32, #tpu.memory_space<vmem>>, vector<1x1x64x64xf32>
    %122 = vector.shape_cast %121 : vector<1x1x64x64xf32> to vector<64x64xf32>
    %123 = vector.broadcast %120 : f32 to vector<64x64xf32>
    %124 = arith.mulf %123, %122 : vector<64x64xf32>
    %125 = arith.addf %119, %124 : vector<64x64xf32>
    %c4_125 = arith.constant 4 : index
    %c2_126 = arith.constant 2 : index
    %126 = memref.load %arg2[%c4_125, %c2_126] : memref<8x4xf32, #tpu.memory_space<smem>>
    %c0_127 = arith.constant 0 : index
    %c2_128 = arith.constant 2 : index
    %c0_129 = arith.constant 0 : index
    %c0_130 = arith.constant 0 : index
    %127 = vector.load %arg1[%c0_127, %c2_128, %c0_129, %c0_130] : memref<1x3x64x64xf32, #tpu.memory_space<vmem>>, vector<1x1x64x64xf32>
    %128 = vector.shape_cast %127 : vector<1x1x64x64xf32> to vector<64x64xf32>
    %129 = vector.broadcast %126 : f32 to vector<64x64xf32>
    %130 = arith.mulf %129, %128 : vector<64x64xf32>
    %131 = arith.addf %125, %130 : vector<64x64xf32>
    %c0_131 = arith.constant 0 : index
    %c4_132 = arith.constant 4 : index
    %c1_133 = arith.constant 1 : index
    %c1_134 = arith.constant 1 : index
    %132 = vector.load %arg3[%c0_131, %c4_132, %c1_133, %c1_134] : memref<1x8x66x66xf32, #tpu.memory_space<vmem>>, vector<1x1x64x64xf32>
    %133 = vector.shape_cast %132 : vector<1x1x64x64xf32> to vector<64x64xf32>
    %134 = vector.shape_cast %131 : vector<64x64xf32> to vector<1x1x64x64xf32>
    tpu.vector_store %arg3[%c0_131, %c4_132, %c1_133, %c1_134], %134 {strides = array<i32>} : memref<1x8x66x66xf32, #tpu.memory_space<vmem>>, vector<1x1x64x64xf32>,
    %c5 = arith.constant 5 : index
    %c3_135 = arith.constant 3 : index
    %135 = memref.load %arg2[%c5, %c3_135] : memref<8x4xf32, #tpu.memory_space<smem>>
    %136 = vector.broadcast %135 : f32 to vector<66x66xf32>
    %c0_136 = arith.constant 0 : index
    %c5_137 = arith.constant 5 : index
    %c0_138 = arith.constant 0 : index
    %c0_139 = arith.constant 0 : index
    %137 = vector.load %arg3[%c0_136, %c5_137, %c0_138, %c0_139] : memref<1x8x66x66xf32, #tpu.memory_space<vmem>>, vector<1x1x66x66xf32>
    %138 = vector.shape_cast %137 : vector<1x1x66x66xf32> to vector<66x66xf32>
    %139 = vector.shape_cast %136 : vector<66x66xf32> to vector<1x1x66x66xf32>
    tpu.vector_store %arg3[%c0_136, %c5_137, %c0_138, %c0_139], %139 {strides = array<i32>} : memref<1x8x66x66xf32, #tpu.memory_space<vmem>>, vector<1x1x66x66xf32>,
    %140 = vector.broadcast %135 : f32 to vector<64x64xf32>
    %c5_140 = arith.constant 5 : index
    %c0_141 = arith.constant 0 : index
    %141 = memref.load %arg2[%c5_140, %c0_141] : memref<8x4xf32, #tpu.memory_space<smem>>
    %c0_142 = arith.constant 0 : index
    %c0_143 = arith.constant 0 : index
    %c0_144 = arith.constant 0 : index
    %c0_145 = arith.constant 0 : index
    %142 = vector.load %arg1[%c0_142, %c0_143, %c0_144, %c0_145] : memref<1x3x64x64xf32, #tpu.memory_space<vmem>>, vector<1x1x64x64xf32>
    %143 = vector.shape_cast %142 : vector<1x1x64x64xf32> to vector<64x64xf32>
    %144 = vector.broadcast %141 : f32 to vector<64x64xf32>
    %145 = arith.mulf %144, %143 : vector<64x64xf32>
    %146 = arith.addf %140, %145 : vector<64x64xf32>
    %c5_146 = arith.constant 5 : index
    %c1_147 = arith.constant 1 : index
    %147 = memref.load %arg2[%c5_146, %c1_147] : memref<8x4xf32, #tpu.memory_space<smem>>
    %c0_148 = arith.constant 0 : index
    %c1_149 = arith.constant 1 : index
    %c0_150 = arith.constant 0 : index
    %c0_151 = arith.constant 0 : index
    %148 = vector.load %arg1[%c0_148, %c1_149, %c0_150, %c0_151] : memref<1x3x64x64xf32, #tpu.memory_space<vmem>>, vector<1x1x64x64xf32>
    %149 = vector.shape_cast %148 : vector<1x1x64x64xf32> to vector<64x64xf32>
    %150 = vector.broadcast %147 : f32 to vector<64x64xf32>
    %151 = arith.mulf %150, %149 : vector<64x64xf32>
    %152 = arith.addf %146, %151 : vector<64x64xf32>
    %c5_152 = arith.constant 5 : index
    %c2_153 = arith.constant 2 : index
    %153 = memref.load %arg2[%c5_152, %c2_153] : memref<8x4xf32, #tpu.memory_space<smem>>
    %c0_154 = arith.constant 0 : index
    %c2_155 = arith.constant 2 : index
    %c0_156 = arith.constant 0 : index
    %c0_157 = arith.constant 0 : index
    %154 = vector.load %arg1[%c0_154, %c2_155, %c0_156, %c0_157] : memref<1x3x64x64xf32, #tpu.memory_space<vmem>>, vector<1x1x64x64xf32>
    %155 = vector.shape_cast %154 : vector<1x1x64x64xf32> to vector<64x64xf32>
    %156 = vector.broadcast %153 : f32 to vector<64x64xf32>
    %157 = arith.mulf %156, %155 : vector<64x64xf32>
    %158 = arith.addf %152, %157 : vector<64x64xf32>
    %c0_158 = arith.constant 0 : index
    %c5_159 = arith.constant 5 : index
    %c1_160 = arith.constant 1 : index
    %c1_161 = arith.constant 1 : index
    %159 = vector.load %arg3[%c0_158, %c5_159, %c1_160, %c1_161] : memref<1x8x66x66xf32, #tpu.memory_space<vmem>>, vector<1x1x64x64xf32>
    %160 = vector.shape_cast %159 : vector<1x1x64x64xf32> to vector<64x64xf32>
    %161 = vector.shape_cast %158 : vector<64x64xf32> to vector<1x1x64x64xf32>
    tpu.vector_store %arg3[%c0_158, %c5_159, %c1_160, %c1_161], %161 {strides = array<i32>} : memref<1x8x66x66xf32, #tpu.memory_space<vmem>>, vector<1x1x64x64xf32>,
    %c6 = arith.constant 6 : index
    %c3_162 = arith.constant 3 : index
    %162 = memref.load %arg2[%c6, %c3_162] : memref<8x4xf32, #tpu.memory_space<smem>>
    %163 = vector.broadcast %162 : f32 to vector<66x66xf32>
    %c0_163 = arith.constant 0 : index
    %c6_164 = arith.constant 6 : index
    %c0_165 = arith.constant 0 : index
    %c0_166 = arith.constant 0 : index
    %164 = vector.load %arg3[%c0_163, %c6_164, %c0_165, %c0_166] : memref<1x8x66x66xf32, #tpu.memory_space<vmem>>, vector<1x1x66x66xf32>
    %165 = vector.shape_cast %164 : vector<1x1x66x66xf32> to vector<66x66xf32>
    %166 = vector.shape_cast %163 : vector<66x66xf32> to vector<1x1x66x66xf32>
    tpu.vector_store %arg3[%c0_163, %c6_164, %c0_165, %c0_166], %166 {strides = array<i32>} : memref<1x8x66x66xf32, #tpu.memory_space<vmem>>, vector<1x1x66x66xf32>,
    %167 = vector.broadcast %162 : f32 to vector<64x64xf32>
    %c6_167 = arith.constant 6 : index
    %c0_168 = arith.constant 0 : index
    %168 = memref.load %arg2[%c6_167, %c0_168] : memref<8x4xf32, #tpu.memory_space<smem>>
    %c0_169 = arith.constant 0 : index
    %c0_170 = arith.constant 0 : index
    %c0_171 = arith.constant 0 : index
    %c0_172 = arith.constant 0 : index
    %169 = vector.load %arg1[%c0_169, %c0_170, %c0_171, %c0_172] : memref<1x3x64x64xf32, #tpu.memory_space<vmem>>, vector<1x1x64x64xf32>
    %170 = vector.shape_cast %169 : vector<1x1x64x64xf32> to vector<64x64xf32>
    %171 = vector.broadcast %168 : f32 to vector<64x64xf32>
    %172 = arith.mulf %171, %170 : vector<64x64xf32>
    %173 = arith.addf %167, %172 : vector<64x64xf32>
    %c6_173 = arith.constant 6 : index
    %c1_174 = arith.constant 1 : index
    %174 = memref.load %arg2[%c6_173, %c1_174] : memref<8x4xf32, #tpu.memory_space<smem>>
    %c0_175 = arith.constant 0 : index
    %c1_176 = arith.constant 1 : index
    %c0_177 = arith.constant 0 : index
    %c0_178 = arith.constant 0 : index
    %175 = vector.load %arg1[%c0_175, %c1_176, %c0_177, %c0_178] : memref<1x3x64x64xf32, #tpu.memory_space<vmem>>, vector<1x1x64x64xf32>
    %176 = vector.shape_cast %175 : vector<1x1x64x64xf32> to vector<64x64xf32>
    %177 = vector.broadcast %174 : f32 to vector<64x64xf32>
    %178 = arith.mulf %177, %176 : vector<64x64xf32>
    %179 = arith.addf %173, %178 : vector<64x64xf32>
    %c6_179 = arith.constant 6 : index
    %c2_180 = arith.constant 2 : index
    %180 = memref.load %arg2[%c6_179, %c2_180] : memref<8x4xf32, #tpu.memory_space<smem>>
    %c0_181 = arith.constant 0 : index
    %c2_182 = arith.constant 2 : index
    %c0_183 = arith.constant 0 : index
    %c0_184 = arith.constant 0 : index
    %181 = vector.load %arg1[%c0_181, %c2_182, %c0_183, %c0_184] : memref<1x3x64x64xf32, #tpu.memory_space<vmem>>, vector<1x1x64x64xf32>
    %182 = vector.shape_cast %181 : vector<1x1x64x64xf32> to vector<64x64xf32>
    %183 = vector.broadcast %180 : f32 to vector<64x64xf32>
    %184 = arith.mulf %183, %182 : vector<64x64xf32>
    %185 = arith.addf %179, %184 : vector<64x64xf32>
    %c0_185 = arith.constant 0 : index
    %c6_186 = arith.constant 6 : index
    %c1_187 = arith.constant 1 : index
    %c1_188 = arith.constant 1 : index
    %186 = vector.load %arg3[%c0_185, %c6_186, %c1_187, %c1_188] : memref<1x8x66x66xf32, #tpu.memory_space<vmem>>, vector<1x1x64x64xf32>
    %187 = vector.shape_cast %186 : vector<1x1x64x64xf32> to vector<64x64xf32>
    %188 = vector.shape_cast %185 : vector<64x64xf32> to vector<1x1x64x64xf32>
    tpu.vector_store %arg3[%c0_185, %c6_186, %c1_187, %c1_188], %188 {strides = array<i32>} : memref<1x8x66x66xf32, #tpu.memory_space<vmem>>, vector<1x1x64x64xf32>,
    %c7 = arith.constant 7 : index
    %c3_189 = arith.constant 3 : index
    %189 = memref.load %arg2[%c7, %c3_189] : memref<8x4xf32, #tpu.memory_space<smem>>
    %190 = vector.broadcast %189 : f32 to vector<66x66xf32>
    %c0_190 = arith.constant 0 : index
    %c7_191 = arith.constant 7 : index
    %c0_192 = arith.constant 0 : index
    %c0_193 = arith.constant 0 : index
    %191 = vector.load %arg3[%c0_190, %c7_191, %c0_192, %c0_193] : memref<1x8x66x66xf32, #tpu.memory_space<vmem>>, vector<1x1x66x66xf32>
    %192 = vector.shape_cast %191 : vector<1x1x66x66xf32> to vector<66x66xf32>
    %193 = vector.shape_cast %190 : vector<66x66xf32> to vector<1x1x66x66xf32>
    tpu.vector_store %arg3[%c0_190, %c7_191, %c0_192, %c0_193], %193 {strides = array<i32>} : memref<1x8x66x66xf32, #tpu.memory_space<vmem>>, vector<1x1x66x66xf32>,
    %194 = vector.broadcast %189 : f32 to vector<64x64xf32>
    %c7_194 = arith.constant 7 : index
    %c0_195 = arith.constant 0 : index
    %195 = memref.load %arg2[%c7_194, %c0_195] : memref<8x4xf32, #tpu.memory_space<smem>>
    %c0_196 = arith.constant 0 : index
    %c0_197 = arith.constant 0 : index
    %c0_198 = arith.constant 0 : index
    %c0_199 = arith.constant 0 : index
    %196 = vector.load %arg1[%c0_196, %c0_197, %c0_198, %c0_199] : memref<1x3x64x64xf32, #tpu.memory_space<vmem>>, vector<1x1x64x64xf32>
    %197 = vector.shape_cast %196 : vector<1x1x64x64xf32> to vector<64x64xf32>
    %198 = vector.broadcast %195 : f32 to vector<64x64xf32>
    %199 = arith.mulf %198, %197 : vector<64x64xf32>
    %200 = arith.addf %194, %199 : vector<64x64xf32>
    %c7_200 = arith.constant 7 : index
    %c1_201 = arith.constant 1 : index
    %201 = memref.load %arg2[%c7_200, %c1_201] : memref<8x4xf32, #tpu.memory_space<smem>>
    %c0_202 = arith.constant 0 : index
    %c1_203 = arith.constant 1 : index
    %c0_204 = arith.constant 0 : index
    %c0_205 = arith.constant 0 : index
    %202 = vector.load %arg1[%c0_202, %c1_203, %c0_204, %c0_205] : memref<1x3x64x64xf32, #tpu.memory_space<vmem>>, vector<1x1x64x64xf32>
    %203 = vector.shape_cast %202 : vector<1x1x64x64xf32> to vector<64x64xf32>
    %204 = vector.broadcast %201 : f32 to vector<64x64xf32>
    %205 = arith.mulf %204, %203 : vector<64x64xf32>
    %206 = arith.addf %200, %205 : vector<64x64xf32>
    %c7_206 = arith.constant 7 : index
    %c2_207 = arith.constant 2 : index
    %207 = memref.load %arg2[%c7_206, %c2_207] : memref<8x4xf32, #tpu.memory_space<smem>>
    %c0_208 = arith.constant 0 : index
    %c2_209 = arith.constant 2 : index
    %c0_210 = arith.constant 0 : index
    %c0_211 = arith.constant 0 : index
    %208 = vector.load %arg1[%c0_208, %c2_209, %c0_210, %c0_211] : memref<1x3x64x64xf32, #tpu.memory_space<vmem>>, vector<1x1x64x64xf32>
    %209 = vector.shape_cast %208 : vector<1x1x64x64xf32> to vector<64x64xf32>
    %210 = vector.broadcast %207 : f32 to vector<64x64xf32>
    %211 = arith.mulf %210, %209 : vector<64x64xf32>
    %212 = arith.addf %206, %211 : vector<64x64xf32>
    %c0_212 = arith.constant 0 : index
    %c7_213 = arith.constant 7 : index
    %c1_214 = arith.constant 1 : index
    %c1_215 = arith.constant 1 : index
    %213 = vector.load %arg3[%c0_212, %c7_213, %c1_214, %c1_215] : memref<1x8x66x66xf32, #tpu.memory_space<vmem>>, vector<1x1x64x64xf32>
    %214 = vector.shape_cast %213 : vector<1x1x64x64xf32> to vector<64x64xf32>
    %215 = vector.shape_cast %212 : vector<64x64xf32> to vector<1x1x64x64xf32>
    tpu.vector_store %arg3[%c0_212, %c7_213, %c1_214, %c1_215], %215 {strides = array<i32>} : memref<1x8x66x66xf32, #tpu.memory_space<vmem>>, vector<1x1x64x64xf32>,
    return
  }
  func.func @transform_0(%arg0: i32) -> (i32, i32, i32, i32) {
    %c0_i32 = arith.constant 0 : i32
    %c0_i32_0 = arith.constant 0 : i32
    %c0_i32_1 = arith.constant 0 : i32
    %c0_i32_2 = arith.constant 0 : i32
    return %arg0, %c0_i32, %c0_i32_0, %c0_i32_1 : i32, i32, i32, i32
  }
  func.func @transform_1(%arg0: i32) -> (i32, i32) {
    %c0_i32 = arith.constant 0 : i32
    %c0_i32_0 = arith.constant 0 : i32
    %c0_i32_1 = arith.constant 0 : i32
    return %c0_i32, %c0_i32_0 : i32, i32
  }
  func.func @transform_2(%arg0: i32) -> (i32, i32, i32, i32) {
    %c0_i32 = arith.constant 0 : i32
    %c0_i32_0 = arith.constant 0 : i32
    %c0_i32_1 = arith.constant 0 : i32
    %c0_i32_2 = arith.constant 0 : i32
    return %arg0, %c0_i32, %c0_i32_0, %c0_i32_1 : i32, i32, i32, i32
  }
}

module attributes {stable_mosaic.version = 11 : i64} {
  func.func @_conv1x1_flat_kernel(%arg0: i32, %arg1: i32, %arg2: memref<1x3x2304xf32, #tpu.memory_space<vmem>>, %arg3: memref<8x4xf32, #tpu.memory_space<vmem>>, %arg4: memref<1x8x2304xf32, #tpu.memory_space<vmem>>) attributes {dimension_semantics = [#tpu.dimension_semantics<parallel>, #tpu.dimension_semantics<parallel>], iteration_bounds = array<i64: 1, 2>, scalar_prefetch = 0 : i64, scratch_operands = 0 : i64, tpu.core_type = #tpu.core_type<tc>, window_params = [{transform_indices = @transform_0, window_bounds = array<i64: 1, 3, 2304>}, {pipeline_mode = #tpu.pipeline_mode<synchronous>, transform_indices = @transform_1, window_bounds = array<i64: 8, 4>}, {transform_indices = @transform_2, window_bounds = array<i64: 1, 8, 2304>}]} {
    %c0 = arith.constant 0 : index
    %c0_0 = arith.constant 0 : index
    %c0_1 = arith.constant 0 : index
    %0 = vector.load %arg2[%c0, %c0_0, %c0_1] : memref<1x3x2304xf32, #tpu.memory_space<vmem>>, vector<1x3x2304xf32>
    %1 = vector.shape_cast %0 : vector<1x3x2304xf32> to vector<3x2304xf32>
    %c0_2 = arith.constant 0 : index
    %c0_3 = arith.constant 0 : index
    %2 = vector.load %arg3[%c0_2, %c0_3] : memref<8x4xf32, #tpu.memory_space<vmem>>, vector<8x4xf32>
    %3 = vector.extract_strided_slice %2 {offsets = [0, 0], sizes = [8, 1], strides = [1, 1]} : vector<8x4xf32> to vector<8x1xf32>
    %4 = vector.extract_strided_slice %1 {offsets = [0, 0], sizes = [1, 2304], strides = [1, 1]} : vector<3x2304xf32> to vector<1x2304xf32>
    %5 = vector.broadcast %3 : vector<8x1xf32> to vector<8x2304xf32>
    %6 = vector.broadcast %4 : vector<1x2304xf32> to vector<8x2304xf32>
    %7 = arith.mulf %5, %6 : vector<8x2304xf32>
    %8 = vector.extract_strided_slice %2 {offsets = [0, 3], sizes = [8, 1], strides = [1, 1]} : vector<8x4xf32> to vector<8x1xf32>
    %9 = vector.broadcast %8 : vector<8x1xf32> to vector<8x2304xf32>
    %10 = arith.addf %7, %9 : vector<8x2304xf32>
    %11 = vector.extract_strided_slice %2 {offsets = [0, 1], sizes = [8, 1], strides = [1, 1]} : vector<8x4xf32> to vector<8x1xf32>
    %12 = vector.extract_strided_slice %1 {offsets = [1, 0], sizes = [1, 2304], strides = [1, 1]} : vector<3x2304xf32> to vector<1x2304xf32>
    %13 = vector.broadcast %11 : vector<8x1xf32> to vector<8x2304xf32>
    %14 = vector.broadcast %12 : vector<1x2304xf32> to vector<8x2304xf32>
    %15 = arith.mulf %13, %14 : vector<8x2304xf32>
    %16 = arith.addf %10, %15 : vector<8x2304xf32>
    %17 = vector.extract_strided_slice %2 {offsets = [0, 2], sizes = [8, 1], strides = [1, 1]} : vector<8x4xf32> to vector<8x1xf32>
    %18 = vector.extract_strided_slice %1 {offsets = [2, 0], sizes = [1, 2304], strides = [1, 1]} : vector<3x2304xf32> to vector<1x2304xf32>
    %19 = vector.broadcast %17 : vector<8x1xf32> to vector<8x2304xf32>
    %20 = vector.broadcast %18 : vector<1x2304xf32> to vector<8x2304xf32>
    %21 = arith.mulf %19, %20 : vector<8x2304xf32>
    %22 = arith.addf %16, %21 : vector<8x2304xf32>
    %c0_4 = arith.constant 0 : index
    %c0_5 = arith.constant 0 : index
    %c0_6 = arith.constant 0 : index
    %23 = vector.load %arg4[%c0_4, %c0_5, %c0_6] : memref<1x8x2304xf32, #tpu.memory_space<vmem>>, vector<1x8x2304xf32>
    %24 = vector.shape_cast %23 : vector<1x8x2304xf32> to vector<8x2304xf32>
    %25 = vector.shape_cast %22 : vector<8x2304xf32> to vector<1x8x2304xf32>
    tpu.vector_store %arg4[%c0_4, %c0_5, %c0_6], %25 {strides = array<i32>} : memref<1x8x2304xf32, #tpu.memory_space<vmem>>, vector<1x8x2304xf32>,
    return
  }
  func.func @transform_0(%arg0: i32, %arg1: i32) -> (i32, i32, i32) {
    %c0_i32 = arith.constant 0 : i32
    %c0_i32_0 = arith.constant 0 : i32
    return %arg0, %c0_i32, %arg1 : i32, i32, i32
  }
  func.func @transform_1(%arg0: i32, %arg1: i32) -> (i32, i32) {
    %c0_i32 = arith.constant 0 : i32
    %c0_i32_0 = arith.constant 0 : i32
    %c0_i32_1 = arith.constant 0 : i32
    return %c0_i32, %c0_i32_0 : i32, i32
  }
  func.func @transform_2(%arg0: i32, %arg1: i32) -> (i32, i32, i32) {
    %c0_i32 = arith.constant 0 : i32
    %c0_i32_0 = arith.constant 0 : i32
    return %arg0, %c0_i32, %arg1 : i32, i32, i32
  }
}

</mosaic_0001>

<bundles_post_ra>
// kernel: tpu_custom_call.1
= control target key start
LH: loop header
LB: loop body
LE: loop exit
PB: predicated region body
PF: predicated region fallthrough
CT: control target
= control target key end

     0   :  { %7 = vsyncpa [#allocation3], 0  ;;  %s2661_s0 = inlined_call_operand.hbm [shape: f32[1,3,64,64], index: 0, kind: input, shape index: {}]   ;;  %s2662_s1 = inlined_call_operand.vmem [shape: f32[8,4], index: 1, kind: input, shape index: {}]   ;;  %s2663_s2 = inlined_call_operand.vmem [shape: f32[1,8,66,66], index: 2, kind: output, shape index: {}]  }
   0x1   :  { %8 = vsyncpa [#allocation4], 0  ;;  %s1281_s9 = smov [#allocation2]   ;;  %s27_s13 = sshll.u32 %s2662_s1, 4  ;;  %s28_s13 = int_to_ptr.vmem [resolvable:$true] %s27_s13 }
   0x2   :  { %s14_s10 = sshll.u32 %s1281_s9, 4  ;;  %s1243_s16 = scalar_lea.hbm %s2661_s0, 3072  ;;  %s15_s10 = int_to_ptr.vmem [resolvable:$true] %s14_s10 }
   0x3   :  { %p1244_p0 = scmp.ne.s32.totalorder %s2661_s0, %s1243_s16  ;;  %p1247_p1 = scmp.lt.u32.totalorder %s1243_s16, %s2661_s0 }
   0x5   :  { %p1249_p2 = pnand %p1247_p1, %p1244_p0 }
   0x7   :  { %1252 = shalt.err (!%p1249_p2)
}
   0x8   :  { %s1253_s21 = scalar_lea.vmem %s15_s10, 3072  ;;  %p1258_p4 = scmp.lt.s32.totalorder %s15_s10, %s15_s10 }
   0x9   :  { %p1254_p3 = scmp.ne.s32.totalorder %s15_s10, %s1253_s21  ;;  %p1259_p5 = scmp.lt.s32.totalorder %s1253_s21, %s1253_s21 }
   0xb   :  { %p1260_p6 = por %p1259_p5, %p1258_p4 }
   0xd   :  { %p1261_p7 = pnand %p1260_p6, %p1254_p3 }
   0xf   :  { %1264 = shalt.err (!%p1261_p7)
}
  0x10   :  { %s1282_s1 = smov 128   ;;  %s1283_s22 = smov 8  }
  0x11   :  { %20 = dma.hbm_to_vmem [thread:$0]  %s2661_s0, 3072, %s15_s10, [#allocation3], %s1282_s1, %s1282_s1, %s1283_s22  }
  0x12   :  { %s1265_s25 = scalar_lea.vmem %s28_s13, 128  ;;  %p1270_p9 = scmp.lt.s32.totalorder %s28_s13, %s28_s13 }
  0x13   :  { %p1266_p8 = scmp.ne.s32.totalorder %s28_s13, %s1265_s25  ;;  %p1271_p10 = scmp.lt.s32.totalorder %s1265_s25, %s1265_s25 }
  0x15   :  { %p1272_p11 = por %p1271_p10, %p1270_p9 }
  0x17   :  { %p1273_p12 = pnand %p1272_p11, %p1266_p8 }
  0x19   :  { %1276 = shalt.err (!%p1273_p12)
}
  0x1a   :  { %s1284_s26 = smov [#allocation5]  }
  0x1b   :  { %30 = dma.vmem_to_smem %s28_s13, 128, %s1284_s26, [#allocation4]  }
  0x1c   :  { %1277 = dma.done.wait [#allocation3], 3072  }
  0x1d   :  { %1278 = vsyncadd [#allocation3], 4294964224 }
  0x1e   :  { %1279 = dma.done.wait [#allocation4], 128  }
  0x1f   :  { %1280 = vsyncadd [#allocation4], 4294967168 }
  0x20   :  { %37 = sfence }
  0x21   :  { %s1088_s27 = sld [smem:[#allocation5 + $0x3]]  ;;  %s51_s28 = sld [smem:[#allocation5]]  ;;  %v1316_v0 = vld [vmem:[#allocation2 + $0x10] sm:$0xff]  ;;  %v1320_v2 = vld [vmem:[#allocation2] sm:$0xff]  ;;  %vm40_vm0 = vcmask 539648   ;;  %v1332_v8 = vld [vmem:[#allocation2 + $0x18] sm:$0xff] }
  0x22   :  { %s1089_s29 = sld [smem:[#allocation5 + $0x1]]  ;;  %s1090_s30 = sld [smem:[#allocation5 + $0x2]]  ;;  %v1318_v1 = vld [vmem:[#allocation2 + $0x50] sm:$0xff]  ;;  %v1324_v4 = vld [vmem:[#allocation2 + $0x40] sm:$0xff]  ;;  %v1334_v9 = vld [vmem:[#allocation2 + $0x58] sm:$0xff]  ;;  %vm49_vm1 = vcmask 533504  }
  0x23   :  { %v1322_v3 = vld [vmem:[#allocation2 + $0x90] sm:$0xff]  ;;  %v1326_v5 = vld [vmem:[#allocation2 + $0x80] sm:$0xff]  ;;  %v1336_v10 = vld [vmem:[#allocation2 + $0x98] sm:$0xff]  ;;  %s1352_s0 = sld [smem:[#allocation5 + $0x83]]  ;;  %s1424_s19 = sld [smem:[#allocation5 + $0x80]]  ;;  %vm163_vm2 = vcmask 531464  }
  0x24   :  { %v1346_v15 = vld [vmem:[#allocation2 + $0x8] sm:$0xff]  ;;  %v1414_v29 = vld [vmem:[#allocation2 + $0x20] sm:$0xff]  ;;  %s1426_s20 = sld [smem:[#allocation5 + $0x81]]  ;;  %s1435_s21 = sld [smem:[#allocation5 + $0x82]]  ;;  %v1444_v44 = vld [vmem:[#allocation2 + $0x38] sm:$0xff] }
  0x25   :  { %v1348_v16 = vld [vmem:[#allocation2 + $0x48] sm:$0xff]  ;;  %v1431_v38 = vld [vmem:[#allocation2 + $0x60] sm:$0xff]  ;;  %v1447_v49 = vld [vmem:[#allocation2 + $0x78] sm:$0xff]  ;;  %s1285_s1 = smov 1   ;;  %s1469_s22 = sld [smem:[#allocation5 + $0x103]] }
  0x26   :  { %v1350_v17 = vld [vmem:[#allocation2 + $0x88] sm:$0xff]  ;;  %v1433_v39 = vld [vmem:[#allocation2 + $0xa0] sm:$0xff]  ;;  %v1449_v50 = vld [vmem:[#allocation2 + $0xb8] sm:$0xff]  ;;  %s1542_s10 = sld [smem:[#allocation5 + $0x100]]  ;;  %s1561_s11 = sld [smem:[#allocation5 + $0x101]] }
  0x27   :  { %v1328_v6 = vstv %s1088_s27  ;;  %v1330_v7 = vstv %s51_s28  ;;  %v1402_v22 = vld [vmem:[#allocation2 + $0x28] sm:$0xff]  ;;  %v1456_v55 = vld [vmem:[#allocation2 + $0x30] sm:$0xff]  ;;  %s1617_s28 = sld [smem:[#allocation5 + $0x102]]  ;;  %s1729_s18 = sld [smem:[#allocation5 + $0x181]] }
  0x28   :  { %v63_v11 = vmul.f32 %v1330_v7, %v1316_v0  ;;  %v1340_v12 = vstv %s1089_s29  ;;  %v1342_v13 = vstv %s1090_s30  ;;  %v61_v14 = vmul.f32 %v1330_v7, %v1320_v2  ;;  %43 = vst.msk [vmem:[%s2663_s2 + $0x10] sm:$0xff] %vm40_vm0, %v1328_v6  ;;  %44 = vst.msk [vmem:[%s2663_s2 + $0x18] sm:$0xff] %vm40_vm0, %v1328_v6  ;;  %v1410_v27 = vld [vmem:[#allocation2 + $0x68] sm:$0xff]  ;;  %v1458_v56 = vld [vmem:[#allocation2 + $0x70] sm:$0xff]  ;;  %s1624_s29 = sld [smem:[#allocation5 + $0x183]]  ;;  %s1657_s30 = sld [smem:[#allocation5 + $0x180]] }
  0x29   :  { %41 = vst.msk [vmem:[%s2663_s2] sm:$0xff] %vm40_vm0, %v1328_v6  ;;  %42 = vst.msk [vmem:[%s2663_s2 + $0x8] sm:$0xff] %vm40_vm0, %v1328_v6  ;;  %v90_v18 = vmul.f32 %v1340_v12, %v1318_v1  ;;  %v117_v19 = vmul.f32 %v1342_v13, %v1322_v3  ;;  %v88_v20 = vmul.f32 %v1340_v12, %v1324_v4  ;;  %v1412_v28 = vld [vmem:[#allocation2 + $0xa8] sm:$0xff]  ;;  %v1464_v60 = vld [vmem:[#allocation2 + $0xb0] sm:$0xff]  ;;  %v1467_v61 = vstv %s1352_s0  ;;  %s1839_s8 = sld [smem:[#allocation5 + $0x200]]  ;;  %s1841_s9 = sld [smem:[#allocation5 + $0x283]] }
  0x2a   :  { %45 = vst.msk [vmem:[%s2663_s2 + $0x20] sm:$0xff] %vm40_vm0, %v1328_v6  ;;  %46 = vst.msk [vmem:[%s2663_s2 + $0x28] sm:$0xff] %vm40_vm0, %v1328_v6  ;;  %v115_v21 = vmul.f32 %v1342_v13, %v1326_v5  ;;  %v71_v23 = vadd.f32 %v63_v11, %v1328_v6  ;;  %v69_v24 = vadd.f32 %v61_v14, %v1328_v6  ;;  %s2000_s0 = sld [smem:[#allocation5 + $0x282]]  ;;  %s2274_s27 = sld [smem:[#allocation5 + $0x381]] }
  0x2b   :  { %47 = vst.msk [vmem:[%s2663_s2 + $0x30] sm:$0xff] %vm40_vm0, %v1328_v6  ;;  %48 = vst.msk [vmem:[%s2663_s2 + $0x38] sm:$0xff] %vm40_vm0, %v1328_v6  ;;  %v64_v25 = vmul.f32 %v1330_v7, %v1332_v8  ;;  %v91_v26 = vmul.f32 %v1340_v12, %v1334_v9  ;;  %v118_v30 = vmul.f32 %v1342_v13, %v1336_v10 }
  0x2c   :  { %v62_v31 = vmul.f32 %v1330_v7, %v1346_v15  ;;  %v89_v32 = vmul.f32 %v1340_v12, %v1348_v16  ;;  %v116_v33 = vmul.f32 %v1342_v13, %v1350_v17  ;;  %v98_v34 = vadd.f32 %v90_v18, %v71_v23  ;;  %1092 = vst.msk [vmem:[%s2663_s2 + $0x48] sm:$0xff] %vm40_vm0, %v1467_v61 }
  0x2d   :  { %v96_v35 = vadd.f32 %v88_v20, %v69_v24  ;;  %v72_v36 = vadd.f32 %v64_v25, %v1328_v6  ;;  %v66_v37 = vmul.f32 %v1330_v7, %v1402_v22  ;;  %v93_v41 = vmul.f32 %v1340_v12, %v1410_v27  ;;  %1093 = vst.msk [vmem:[%s2663_s2 + $0x50] sm:$0xff] %vm40_vm0, %v1467_v61 }
  0x2e   :  { %v70_v40 = vadd.f32 %v62_v31, %v1328_v6  ;;  %v120_v42 = vmul.f32 %v1342_v13, %v1412_v28  ;;  %v65_v43 = vmul.f32 %v1330_v7, %v1414_v29  ;;  %v125_v45 = vadd.f32 %v117_v19, %v98_v34  ;;  %1094 = vst.msk [vmem:[%s2663_s2 + $0x58] sm:$0xff] %vm40_vm0, %v1467_v61 }
  0x2f   :  { %v123_v46 = vadd.f32 %v115_v21, %v96_v35  ;;  %v99_v47 = vadd.f32 %v91_v26, %v72_v36  ;;  %v74_v48 = vadd.f32 %v66_v37, %v1328_v6  ;;  %v92_v53 = vmul.f32 %v1340_v12, %v1431_v38  ;;  %1095 = vst.msk [vmem:[%s2663_s2 + $0x60] sm:$0xff] %vm40_vm0, %v1467_v61 }
  0x30   :  { %v97_v51 = vadd.f32 %v89_v32, %v70_v40  ;;  %v73_v52 = vadd.f32 %v65_v43, %v1328_v6  ;;  %v119_v54 = vmul.f32 %v1342_v13, %v1433_v39  ;;  %143 = vrot.lane.b32.xlu1 %v125_v45, %s1285_s1  ;;  %v68_v59 = vmul.f32 %v1330_v7, %v1444_v44 }
  0x31   :  { %139 = vrot.lane.b32.xlu0 %v123_v46, %s1285_s1  ;;  %v126_v57 = vadd.f32 %v118_v30, %v99_v47  ;;  %v101_v58 = vadd.f32 %v93_v41, %v74_v48  ;;  %v95_v11 = vmul.f32 %v1340_v12, %v1447_v49  ;;  %v122_v14 = vmul.f32 %v1342_v13, %v1449_v50 }
  0x32   :  { %v124_v62 = vadd.f32 %v116_v33, %v97_v51  ;;  %v100_v63 = vadd.f32 %v92_v53, %v73_v52  ;;  %1096 = vst.msk [vmem:[%s2663_s2 + $0x68] sm:$0xff] %vm40_vm0, %v1467_v61  ;;  %1097 = vst.msk [vmem:[%s2663_s2 + $0x70] sm:$0xff] %vm40_vm0, %v1467_v61  ;;  %v76_v19 = vadd.f32 %v68_v59, %v1328_v6  ;;  %v1523_v25 = vstv %s1424_s19  ;;  %s1733_s19 = sld [smem:[#allocation5 + $0x203]] }
  0x33   :  { %1098 = vst.msk [vmem:[%s2663_s2 + $0x78] sm:$0xff] %vm40_vm0, %v1467_v61  ;;  %1099 = vst.msk [vmem:[%s2663_s2 + $0x80] sm:$0xff] %vm40_vm0, %v1467_v61  ;;  %v128_v18 = vadd.f32 %v120_v42, %v101_v58  ;;  %v67_v20 = vmul.f32 %v1330_v7, %v1456_v55  ;;  %v94_v21 = vmul.f32 %v1340_v12, %v1458_v56  ;;  %v1526_v26 = vstv %s1426_s20  ;;  %s1752_s20 = sld [smem:[#allocation5 + $0x182]] }
  0x34   :  { %v127_v23 = vadd.f32 %v119_v54, %v100_v63  ;;  %v121_v24 = vmul.f32 %v1342_v13, %v1464_v60  ;;  %145 = vrot.lane.b32.xlu1 %v126_v57, %s1285_s1  ;;  %v103_v30 = vadd.f32 %v95_v11, %v76_v19  ;;  %v195_v7 = vmul.f32 %v1523_v25, %v1346_v15 }
  0x35   :  { %141 = vrot.lane.b32.xlu0 %v124_v62, %s1285_s1  ;;  %v75_v31 = vadd.f32 %v67_v20, %v1328_v6  ;;  %v1534_v32 = vstv %s1435_s21  ;;  %v221_v12 = vmul.f32 %v1526_v26, %v1348_v16  ;;  %v194_v13 = vmul.f32 %v1523_v25, %v1320_v2  ;;  %s2105_s21 = sld [smem:[#allocation5 + $0x301]]  ;;  %50 = vst.msk [vmem:[%s2663_s2 + $0x40] sm:$0x3] %vm49_vm1, %v1328_v6 }
  0x36   :  { %v220_v33 = vmul.f32 %v1526_v26, %v1324_v4  ;;  %v130_v34 = vadd.f32 %v122_v14, %v103_v30  ;;  %v203_v36 = vadd.f32 %v195_v7, %v1467_v61  ;;  %v247_v37 = vmul.f32 %v1534_v32, %v1350_v17  ;;  %1100 = vst.msk [vmem:[%s2663_s2 + $0x88] sm:$0x3] %vm49_vm1, %v1467_v61 }
  0x37   :  { %v102_v35 = vadd.f32 %v94_v21, %v75_v31  ;;  %v202_v40 = vadd.f32 %v194_v13, %v1467_v61  ;;  %v246_v41 = vmul.f32 %v1534_v32, %v1326_v5  ;;  %v197_v42 = vmul.f32 %v1523_v25, %v1332_v8 }
  0x38   :  { %v223_v43 = vmul.f32 %v1526_v26, %v1334_v9  ;;  %149 = vrot.lane.b32.xlu1 %v128_v18, %s1285_s1  ;;  %v229_v46 = vadd.f32 %v221_v12, %v203_v36  ;;  %v196_v47 = vmul.f32 %v1523_v25, %v1316_v0  ;;  %v1559_v48 = vstv %s1469_s22 }
  0x39   :  { %147 = vrot.lane.b32.xlu0 %v127_v23, %s1285_s1  ;;  %v129_v45 = vadd.f32 %v121_v24, %v102_v35  ;;  %v228_v51 = vadd.f32 %v220_v33, %v202_v40  ;;  %v205_v52 = vadd.f32 %v197_v42, %v1467_v61  ;;  %v249_v53 = vmul.f32 %v1534_v32, %v1336_v10 }
  0x3a   :  { %v222_v54 = vmul.f32 %v1526_v26, %v1318_v1  ;;  %1113 = vst.msk [vmem:[%s2663_s2 + $0x90] sm:$0xff] %vm40_vm0, %v1559_v48  ;;  %1114 = vst.msk [vmem:[%s2663_s2 + $0x98] sm:$0xff] %vm40_vm0, %v1559_v48  ;;  %v204_v57 = vadd.f32 %v196_v47, %v1467_v61  ;;  %v248_v58 = vmul.f32 %v1534_v32, %v1322_v3  ;;  %v1632_v31 = vstv %s1542_s10  ;;  %s1855_s10 = sld [smem:[#allocation5 + $0x201]] }
  0x3b   :  { %1115 = vst.msk [vmem:[%s2663_s2 + $0xa0] sm:$0xff] %vm40_vm0, %v1559_v48  ;;  %1116 = vst.msk [vmem:[%s2663_s2 + $0xa8] sm:$0xff] %vm40_vm0, %v1559_v48  ;;  %v199_v59 = vmul.f32 %v1523_v25, %v1402_v22  ;;  %v225_v62 = vmul.f32 %v1526_v26, %v1410_v27  ;;  %v255_v63 = vadd.f32 %v247_v37, %v229_v46  ;;  %v1648_v42 = vstv %s1561_s11  ;;  %s1873_s11 = sld [smem:[#allocation5 + $0x202]] }
  0x3c   :  { %1117 = vst.msk [vmem:[%s2663_s2 + $0xb0] sm:$0xff] %vm40_vm0, %v1559_v48  ;;  %1118 = vst.msk [vmem:[%s2663_s2 + $0xb8] sm:$0xff] %vm40_vm0, %v1559_v48  ;;  %v254_v11 = vadd.f32 %v246_v41, %v228_v51  ;;  %v231_v14 = vadd.f32 %v223_v43, %v205_v52  ;;  %v198_v18 = vmul.f32 %v1523_v25, %v1414_v29  ;;  %153 = vrot.lane.b32.xlu1 %v130_v34, %s1285_s1 }
  0x3d   :  { %1119 = vst.msk [vmem:[%s2663_s2 + $0xc0] sm:$0xff] %vm40_vm0, %v1559_v48  ;;  %1120 = vst.msk [vmem:[%s2663_s2 + $0xc8] sm:$0xff] %vm40_vm0, %v1559_v48  ;;  %151 = vrot.lane.b32.xlu0 %v129_v45, %s1285_s1  ;;  %v230_v19 = vadd.f32 %v222_v54, %v204_v57  ;;  %v207_v20 = vadd.f32 %v199_v59, %v1467_v61  ;;  %v224_v21 = vmul.f32 %v1526_v26, %v1431_v38 }
  0x3e   :  { %v251_v23 = vmul.f32 %v1534_v32, %v1412_v28  ;;  %v206_v24 = vadd.f32 %v198_v18, %v1467_v61  ;;  %v201_v30 = vmul.f32 %v1523_v25, %v1444_v44  ;;  %v250_v12 = vmul.f32 %v1534_v32, %v1433_v39  ;;  %1121 = vst.msk [vmem:[%s2663_s2 + $0xd0] sm:$0x3] %vm49_vm1, %v1559_v48 }
  0x3f   :  { %v233_v7 = vadd.f32 %v225_v62, %v207_v20  ;;  %v227_v13 = vmul.f32 %v1526_v26, %v1447_v49  ;;  %v257_v33 = vadd.f32 %v249_v53, %v231_v14  ;;  %v200_v36 = vmul.f32 %v1523_v25, %v1456_v55 }
  0x40   :  { %v232_v34 = vadd.f32 %v224_v21, %v206_v24  ;;  %v209_v35 = vadd.f32 %v201_v30, %v1467_v61  ;;  %272 = vrot.lane.b32.xlu1 %v255_v63, %s1285_s1  ;;  %v256_v37 = vadd.f32 %v248_v58, %v230_v19  ;;  %v226_v40 = vmul.f32 %v1526_v26, %v1458_v56 }
  0x41   :  { %270 = vrot.lane.b32.xlu0 %v254_v11, %s1285_s1  ;;  %v325_v41 = vmul.f32 %v1632_v31, %v1346_v15  ;;  %v259_v43 = vadd.f32 %v251_v23, %v233_v7  ;;  %v253_v45 = vmul.f32 %v1534_v32, %v1449_v50  ;;  %v208_v25 = vadd.f32 %v200_v36, %v1467_v61 }
  0x42   :  { %v258_v46 = vadd.f32 %v250_v12, %v232_v34  ;;  %v235_v47 = vadd.f32 %v227_v13, %v209_v35  ;;  %v252_v51 = vmul.f32 %v1534_v32, %v1464_v60  ;;  %v324_v26 = vmul.f32 %v1632_v31, %v1320_v2 }
  0x43   :  { %v333_v52 = vadd.f32 %v325_v41, %v1559_v48  ;;  %v351_v53 = vmul.f32 %v1648_v42, %v1348_v16  ;;  %v1663_v54 = vstv %s1617_s28  ;;  %v350_v57 = vmul.f32 %v1648_v42, %v1324_v4  ;;  %s1952_s28 = sld [smem:[#allocation5 + $0x280]] }
  0x44   :  { %276 = vrot.lane.b32.xlu1 %v257_v33, %s1285_s1  ;;  %v234_v32 = vadd.f32 %v226_v40, %v208_v25  ;;  %v332_v58 = vadd.f32 %v324_v26, %v1559_v48  ;;  %v327_v59 = vmul.f32 %v1632_v31, %v1332_v8  ;;  %v1673_v62 = vstv %s1624_s29  ;;  %s1965_s29 = sld [smem:[#allocation5 + $0x303]] }
  0x45   :  { %274 = vrot.lane.b32.xlu0 %v256_v37, %s1285_s1  ;;  %v326_v63 = vmul.f32 %v1632_v31, %v1316_v0  ;;  %1134 = vst.msk [vmem:[%s2663_s2 + $0xd8] sm:$0xff] %vm40_vm0, %v1673_v62  ;;  %1135 = vst.msk [vmem:[%s2663_s2 + $0xe0] sm:$0xff] %vm40_vm0, %v1673_v62  ;;  %v261_v11 = vadd.f32 %v253_v45, %v235_v47  ;;  %v377_v14 = vmul.f32 %v1663_v54, %v1350_v17 }
  0x46   :  { %1136 = vst.msk [vmem:[%s2663_s2 + $0xe8] sm:$0xff] %vm40_vm0, %v1673_v62  ;;  %1137 = vst.msk [vmem:[%s2663_s2 + $0xf0] sm:$0xff] %vm40_vm0, %v1673_v62  ;;  %v335_v18 = vadd.f32 %v327_v59, %v1559_v48  ;;  %v353_v19 = vmul.f32 %v1648_v42, %v1334_v9  ;;  %v376_v20 = vmul.f32 %v1663_v54, %v1326_v5  ;;  %v1745_v40 = vstv %s1657_s30  ;;  %s1974_s30 = sld [smem:[#allocation5 + $0x281]] }
  0x47   :  { %1138 = vst.msk [vmem:[%s2663_s2 + $0xf8] sm:$0xff] %vm40_vm0, %v1673_v62  ;;  %1139 = vst.msk [vmem:[%s2663_s2 + $0x100] sm:$0xff] %vm40_vm0, %v1673_v62  ;;  %v334_v21 = vadd.f32 %v326_v63, %v1559_v48  ;;  %v352_v23 = vmul.f32 %v1648_v42, %v1318_v1  ;;  %v329_v24 = vmul.f32 %v1632_v31, %v1402_v22 }
  0x48   :  { %1140 = vst.msk [vmem:[%s2663_s2 + $0x108] sm:$0xff] %vm40_vm0, %v1673_v62  ;;  %1141 = vst.msk [vmem:[%s2663_s2 + $0x110] sm:$0xff] %vm40_vm0, %v1673_v62  ;;  %280 = vrot.lane.b32.xlu1 %v259_v43, %s1285_s1  ;;  %v260_v30 = vadd.f32 %v252_v51, %v234_v32  ;;  %v359_v7 = vadd.f32 %v351_v53, %v333_v52  ;;  %v358_v12 = vadd.f32 %v350_v57, %v332_v58 }
  0x49   :  { %278 = vrot.lane.b32.xlu0 %v258_v46, %s1285_s1  ;;  %v337_v13 = vadd.f32 %v329_v24, %v1559_v48  ;;  %v355_v33 = vmul.f32 %v1648_v42, %v1410_v27  ;;  %v328_v34 = vmul.f32 %v1632_v31, %v1414_v29  ;;  %v361_v35 = vadd.f32 %v353_v19, %v335_v18 }
  0x4a   :  { %v379_v36 = vmul.f32 %v1663_v54, %v1336_v10  ;;  %v378_v37 = vmul.f32 %v1663_v54, %v1322_v3  ;;  %v360_v41 = vadd.f32 %v352_v23, %v334_v21  ;;  %v354_v45 = vmul.f32 %v1648_v42, %v1431_v38  ;;  %1142 = vst.msk [vmem:[%s2663_s2 + $0x118] sm:$0x3] %vm49_vm1, %v1673_v62 }
  0x4b   :  { %v336_v43 = vadd.f32 %v328_v34, %v1559_v48  ;;  %v331_v25 = vmul.f32 %v1632_v31, %v1444_v44  ;;  %v385_v46 = vadd.f32 %v377_v14, %v359_v7  ;;  %v384_v47 = vadd.f32 %v376_v20, %v358_v12 }
  0x4c   :  { %284 = vrot.lane.b32.xlu1 %v261_v11, %s1285_s1  ;;  %v330_v51 = vmul.f32 %v1632_v31, %v1456_v55  ;;  %v363_v26 = vadd.f32 %v355_v33, %v337_v13  ;;  %v381_v52 = vmul.f32 %v1663_v54, %v1412_v28  ;;  %v387_v53 = vadd.f32 %v379_v36, %v361_v35 }
  0x4d   :  { %282 = vrot.lane.b32.xlu0 %v260_v30, %s1285_s1  ;;  %v380_v57 = vmul.f32 %v1663_v54, %v1433_v39  ;;  %v357_v32 = vmul.f32 %v1648_v42, %v1447_v49  ;;  %v455_v58 = vmul.f32 %v1745_v40, %v1346_v15  ;;  %v386_v59 = vadd.f32 %v378_v37, %v360_v41 }
  0x4e   :  { %v362_v63 = vadd.f32 %v354_v45, %v336_v43  ;;  %v339_v11 = vadd.f32 %v331_v25, %v1559_v48  ;;  %v1768_v31 = vstv %s1729_s18  ;;  %v338_v14 = vadd.f32 %v330_v51, %v1559_v48 }
  0x4f   :  { %v356_v18 = vmul.f32 %v1648_v42, %v1458_v56  ;;  %v454_v19 = vmul.f32 %v1745_v40, %v1320_v2  ;;  %v1778_v20 = vstv %s1733_s19  ;;  %v389_v21 = vadd.f32 %v381_v52, %v363_v26  ;;  %s2068_s19 = sld [smem:[#allocation5 + $0x383]] }
  0x50   :  { %402 = vrot.lane.b32.xlu1 %v385_v46, %s1285_s1  ;;  %v383_v23 = vmul.f32 %v1663_v54, %v1449_v50  ;;  %1155 = vst.msk [vmem:[%s2663_s2 + $0x120] sm:$0xff] %vm40_vm0, %v1778_v20  ;;  %1156 = vst.msk [vmem:[%s2663_s2 + $0x128] sm:$0xff] %vm40_vm0, %v1778_v20  ;;  %v382_v42 = vmul.f32 %v1663_v54, %v1464_v60  ;;  %v463_v24 = vadd.f32 %v455_v58, %v1673_v62 }
  0x51   :  { %400 = vrot.lane.b32.xlu0 %v384_v47, %s1285_s1  ;;  %1157 = vst.msk [vmem:[%s2663_s2 + $0x130] sm:$0xff] %vm40_vm0, %v1778_v20  ;;  %1158 = vst.msk [vmem:[%s2663_s2 + $0x138] sm:$0xff] %vm40_vm0, %v1778_v20  ;;  %v481_v30 = vmul.f32 %v1768_v31, %v1348_v16  ;;  %v457_v7 = vmul.f32 %v1745_v40, %v1332_v8  ;;  %v388_v12 = vadd.f32 %v380_v57, %v362_v63 }
  0x52   :  { %1159 = vst.msk [vmem:[%s2663_s2 + $0x140] sm:$0xff] %vm40_vm0, %v1778_v20  ;;  %1160 = vst.msk [vmem:[%s2663_s2 + $0x148] sm:$0xff] %vm40_vm0, %v1778_v20  ;;  %v365_v13 = vadd.f32 %v357_v32, %v339_v11  ;;  %v1830_v33 = vstv %s1752_s20  ;;  %v456_v34 = vmul.f32 %v1745_v40, %v1316_v0  ;;  %v364_v54 = vadd.f32 %v356_v18, %v338_v14  ;;  %s2084_s20 = sld [smem:[#allocation5 + $0x300]] }
  0x53   :  { %1161 = vst.msk [vmem:[%s2663_s2 + $0x150] sm:$0xff] %vm40_vm0, %v1778_v20  ;;  %1162 = vst.msk [vmem:[%s2663_s2 + $0x158] sm:$0xff] %vm40_vm0, %v1778_v20  ;;  %v462_v35 = vadd.f32 %v454_v19, %v1673_v62  ;;  %v480_v36 = vmul.f32 %v1768_v31, %v1324_v4  ;;  %v459_v37 = vmul.f32 %v1745_v40, %v1402_v22 }
  0x54   :  { %406 = vrot.lane.b32.xlu1 %v387_v53, %s1285_s1  ;;  %v489_v41 = vadd.f32 %v481_v30, %v463_v24  ;;  %v507_v43 = vmul.f32 %v1830_v33, %v1350_v17  ;;  %v465_v45 = vadd.f32 %v457_v7, %v1673_v62  ;;  %v483_v25 = vmul.f32 %v1768_v31, %v1334_v9 }
  0x55   :  { %404 = vrot.lane.b32.xlu0 %v386_v59, %s1285_s1  ;;  %v391_v46 = vadd.f32 %v383_v23, %v365_v13  ;;  %v464_v47 = vadd.f32 %v456_v34, %v1673_v62  ;;  %v482_v51 = vmul.f32 %v1768_v31, %v1318_v1  ;;  %v458_v26 = vmul.f32 %v1745_v40, %v1414_v29 }
  0x56   :  { %v390_v52 = vadd.f32 %v382_v42, %v364_v54  ;;  %v488_v53 = vadd.f32 %v480_v36, %v462_v35  ;;  %v506_v57 = vmul.f32 %v1830_v33, %v1326_v5  ;;  %v467_v32 = vadd.f32 %v459_v37, %v1673_v62  ;;  %1163 = vst.msk [vmem:[%s2663_s2 + $0x160] sm:$0x3] %vm49_vm1, %v1778_v20 }
  0x57   :  { %v485_v58 = vmul.f32 %v1768_v31, %v1410_v27  ;;  %v515_v59 = vadd.f32 %v507_v43, %v489_v41  ;;  %v491_v63 = vadd.f32 %v483_v25, %v465_v45  ;;  %v509_v11 = vmul.f32 %v1830_v33, %v1336_v10 }
  0x58   :  { %410 = vrot.lane.b32.xlu1 %v389_v21, %s1285_s1  ;;  %v461_v14 = vmul.f32 %v1745_v40, %v1444_v44  ;;  %v490_v18 = vadd.f32 %v482_v51, %v464_v47  ;;  %v508_v19 = vmul.f32 %v1830_v33, %v1322_v3  ;;  %v466_v21 = vadd.f32 %v458_v26, %v1673_v62 }
  0x59   :  { %408 = vrot.lane.b32.xlu0 %v388_v12, %s1285_s1  ;;  %v484_v23 = vmul.f32 %v1768_v31, %v1431_v38  ;;  %v514_v42 = vadd.f32 %v506_v57, %v488_v53  ;;  %v460_v24 = vmul.f32 %v1745_v40, %v1456_v55  ;;  %v1880_v30 = vstv %s1839_s8 }
  0x5a   :  { %v1883_v7 = vstv %s1841_s9  ;;  %v493_v12 = vadd.f32 %v485_v58, %v467_v32  ;;  %v511_v13 = vmul.f32 %v1830_v33, %v1412_v28  ;;  %v517_v40 = vadd.f32 %v509_v11, %v491_v63  ;;  %s2159_s9 = sld [smem:[#allocation5 + $0x302]] }
  0x5b   :  { %1176 = vst.msk [vmem:[%s2663_s2 + $0x168] sm:$0xff] %vm40_vm0, %v1883_v7  ;;  %1177 = vst.msk [vmem:[%s2663_s2 + $0x170] sm:$0xff] %vm40_vm0, %v1883_v7  ;;  %v510_v34 = vmul.f32 %v1830_v33, %v1433_v39  ;;  %v469_v54 = vadd.f32 %v461_v14, %v1673_v62  ;;  %v487_v35 = vmul.f32 %v1768_v31, %v1447_v49  ;;  %v1935_v43 = vstv %s1855_s10  ;;  %s2210_s10 = sld [smem:[#allocation5 + $0x380]] }
  0x5c   :  { %414 = vrot.lane.b32.xlu1 %v391_v46, %s1285_s1  ;;  %1178 = vst.msk [vmem:[%s2663_s2 + $0x178] sm:$0xff] %vm40_vm0, %v1883_v7  ;;  %1179 = vst.msk [vmem:[%s2663_s2 + $0x180] sm:$0xff] %vm40_vm0, %v1883_v7  ;;  %v516_v36 = vadd.f32 %v508_v19, %v490_v18  ;;  %v492_v37 = vadd.f32 %v484_v23, %v466_v21  ;;  %v585_v41 = vmul.f32 %v1880_v30, %v1346_v15 }
  0x5d   :  { %412 = vrot.lane.b32.xlu0 %v390_v52, %s1285_s1  ;;  %1180 = vst.msk [vmem:[%s2663_s2 + $0x188] sm:$0xff] %vm40_vm0, %v1883_v7  ;;  %1181 = vst.msk [vmem:[%s2663_s2 + $0x190] sm:$0xff] %vm40_vm0, %v1883_v7  ;;  %v468_v45 = vadd.f32 %v460_v24, %v1673_v62  ;;  %v486_v25 = vmul.f32 %v1768_v31, %v1458_v56  ;;  %v584_v46 = vmul.f32 %v1880_v30, %v1320_v2  ;;  %v2270_v62 = vld [vmem:[#allocation2 + $0x98] sm:$0xff] }
  0x5e   :  { %1182 = vst.msk [vmem:[%s2663_s2 + $0x198] sm:$0xff] %vm40_vm0, %v1883_v7  ;;  %1183 = vst.msk [vmem:[%s2663_s2 + $0x1a0] sm:$0xff] %vm40_vm0, %v1883_v7  ;;  %v519_v47 = vadd.f32 %v511_v13, %v493_v12  ;;  %v513_v51 = vmul.f32 %v1830_v33, %v1449_v50  ;;  %v495_v26 = vadd.f32 %v487_v35, %v469_v54  ;;  %v1956_v58 = vstv %s1873_s11 }
  0x5f   :  { %v512_v52 = vmul.f32 %v1830_v33, %v1464_v60  ;;  %v611_v53 = vmul.f32 %v1935_v43, %v1348_v16  ;;  %v587_v57 = vmul.f32 %v1880_v30, %v1332_v8  ;;  %v518_v31 = vadd.f32 %v510_v34, %v492_v37  ;;  %1184 = vst.msk [vmem:[%s2663_s2 + $0x1a8] sm:$0x3] %vm49_vm1, %v1883_v7 }
  0x60   :  { %532 = vrot.lane.b32.xlu1 %v515_v59, %s1285_s1  ;;  %v593_v32 = vadd.f32 %v585_v41, %v1778_v20  ;;  %v586_v59 = vmul.f32 %v1880_v30, %v1316_v0  ;;  %v494_v33 = vadd.f32 %v486_v25, %v468_v45  ;;  %v592_v63 = vadd.f32 %v584_v46, %v1778_v20 }
  0x61   :  { %530 = vrot.lane.b32.xlu0 %v514_v42, %s1285_s1  ;;  %v610_v11 = vmul.f32 %v1935_v43, %v1324_v4  ;;  %v589_v14 = vmul.f32 %v1880_v30, %v1402_v22  ;;  %v521_v18 = vadd.f32 %v513_v51, %v495_v26  ;;  %v637_v19 = vmul.f32 %v1956_v58, %v1350_v17 }
  0x62   :  { %v595_v21 = vadd.f32 %v587_v57, %v1778_v20  ;;  %v613_v23 = vmul.f32 %v1935_v43, %v1334_v9  ;;  %v619_v42 = vadd.f32 %v611_v53, %v593_v32  ;;  %v594_v24 = vadd.f32 %v586_v59, %v1778_v20 }
  0x63   :  { %v612_v12 = vmul.f32 %v1935_v43, %v1318_v1  ;;  %v588_v13 = vmul.f32 %v1880_v30, %v1414_v29  ;;  %v618_v34 = vadd.f32 %v610_v11, %v592_v63  ;;  %v636_v54 = vmul.f32 %v1956_v58, %v1326_v5 }
  0x64   :  { %536 = vrot.lane.b32.xlu1 %v517_v40, %s1285_s1  ;;  %v520_v40 = vadd.f32 %v512_v52, %v494_v33  ;;  %v597_v35 = vadd.f32 %v589_v14, %v1778_v20  ;;  %v621_v37 = vadd.f32 %v613_v23, %v595_v21  ;;  %v639_v41 = vmul.f32 %v1956_v58, %v1336_v10 }
  0x65   :  { %534 = vrot.lane.b32.xlu0 %v516_v36, %s1285_s1  ;;  %v615_v36 = vmul.f32 %v1935_v43, %v1410_v27  ;;  %v638_v45 = vmul.f32 %v1956_v58, %v1322_v3  ;;  %v1993_v25 = vstv %s1952_s28  ;;  %v620_v46 = vadd.f32 %v612_v12, %v594_v24  ;;  %s2304_s28 = sld [smem:[#allocation5 + $0x382]] }
  0x66   :  { %v614_v51 = vmul.f32 %v1935_v43, %v1431_v38  ;;  %v591_v26 = vmul.f32 %v1880_v30, %v1444_v44  ;;  %v645_v52 = vadd.f32 %v637_v19, %v619_v42  ;;  %v644_v53 = vadd.f32 %v636_v54, %v618_v34 }
  0x67   :  { %v590_v57 = vmul.f32 %v1880_v30, %v1456_v55  ;;  %v623_v32 = vadd.f32 %v615_v36, %v597_v35  ;;  %v641_v59 = vmul.f32 %v1956_v58, %v1412_v28  ;;  %v647_v30 = vadd.f32 %v639_v41, %v621_v37 }
  0x68   :  { %540 = vrot.lane.b32.xlu1 %v519_v47, %s1285_s1  ;;  %v596_v47 = vadd.f32 %v588_v13, %v1778_v20  ;;  %v640_v33 = vmul.f32 %v1956_v58, %v1433_v39  ;;  %v715_v63 = vmul.f32 %v1993_v25, %v1346_v15  ;;  %v2056_v11 = vstv %s1974_s30 }
  0x69   :  { %538 = vrot.lane.b32.xlu0 %v518_v31, %s1285_s1  ;;  %v2007_v31 = vstv %s1965_s29  ;;  %v646_v14 = vadd.f32 %v638_v45, %v620_v46  ;;  %v599_v19 = vadd.f32 %v591_v26, %v1778_v20  ;;  %v617_v21 = vmul.f32 %v1935_v43, %v1447_v49 }
  0x6a   :  { %1197 = vst.msk [vmem:[%s2663_s2 + $0x1b0] sm:$0xff] %vm40_vm0, %v2007_v31  ;;  %1198 = vst.msk [vmem:[%s2663_s2 + $0x1b8] sm:$0xff] %vm40_vm0, %v2007_v31  ;;  %v598_v23 = vadd.f32 %v590_v57, %v1778_v20  ;;  %v616_v42 = vmul.f32 %v1935_v43, %v1458_v56  ;;  %v714_v24 = vmul.f32 %v1993_v25, %v1320_v2  ;;  %v2080_v2 = vstv %s2000_s0  ;;  %v2272_v20 = vld [vmem:[#allocation2 + $0x90] sm:$0xff] }
  0x6b   :  { %1199 = vst.msk [vmem:[%s2663_s2 + $0x1c0] sm:$0xff] %vm40_vm0, %v2007_v31  ;;  %1200 = vst.msk [vmem:[%s2663_s2 + $0x1c8] sm:$0xff] %vm40_vm0, %v2007_v31  ;;  %v649_v12 = vadd.f32 %v641_v59, %v623_v32  ;;  %v643_v13 = vmul.f32 %v1956_v58, %v1449_v50  ;;  %v723_v34 = vadd.f32 %v715_v63, %v1883_v7  ;;  %v2110_v32 = vstv %s2068_s19 }
  0x6c   :  { %544 = vrot.lane.b32.xlu1 %v521_v18, %s1285_s1  ;;  %1201 = vst.msk [vmem:[%s2663_s2 + $0x1d0] sm:$0xff] %vm40_vm0, %v2007_v31  ;;  %1202 = vst.msk [vmem:[%s2663_s2 + $0x1d8] sm:$0xff] %vm40_vm0, %v2007_v31  ;;  %v622_v18 = vadd.f32 %v614_v51, %v596_v47  ;;  %v741_v54 = vmul.f32 %v2056_v11, %v1348_v16  ;;  %v717_v43 = vmul.f32 %v1993_v25, %v1332_v8 }
  0x6d   :  { %542 = vrot.lane.b32.xlu0 %v520_v40, %s1285_s1  ;;  %1203 = vst.msk [vmem:[%s2663_s2 + $0x1e0] sm:$0xff] %vm40_vm0, %v2007_v31  ;;  %1204 = vst.msk [vmem:[%s2663_s2 + $0x1e8] sm:$0xff] %vm40_vm0, %v2007_v31  ;;  %v642_v40 = vmul.f32 %v1956_v58, %v1464_v60  ;;  %v625_v36 = vadd.f32 %v617_v21, %v599_v19  ;;  %v716_v37 = vmul.f32 %v1993_v25, %v1316_v0  ;;  %v2173_v21 = vld [vmem:[#allocation2] sm:$0xff] }
  0x6e   :  { %v648_v35 = vadd.f32 %v640_v33, %v622_v18  ;;  %v624_v58 = vadd.f32 %v616_v42, %v598_v23  ;;  %v722_v41 = vadd.f32 %v714_v24, %v1883_v7  ;;  %v740_v45 = vmul.f32 %v2056_v11, %v1324_v4  ;;  %1218 = vst.msk [vmem:[%s2663_s2 + $0x1f8] sm:$0xff] %vm40_vm0, %v2110_v32 }
  0x6f   :  { %v719_v8 = vmul.f32 %v1993_v25, %v1402_v22  ;;  %v749_v46 = vadd.f32 %v741_v54, %v723_v34  ;;  %v767_v0 = vmul.f32 %v2080_v2, %v1350_v17  ;;  %v725_v47 = vadd.f32 %v717_v43, %v1883_v7  ;;  %1219 = vst.msk [vmem:[%s2663_s2 + $0x200] sm:$0xff] %vm40_vm0, %v2110_v32  ;;  %v2188_v34 = vld [vmem:[#allocation2 + $0x18] sm:$0xff]  ;;  %v2198_v54 = vld [vmem:[#allocation2 + $0x10] sm:$0xff] }
  0x70   :  { %662 = vrot.lane.b32.xlu1 %v645_v52, %s1285_s1  ;;  %v743_v51 = vmul.f32 %v2056_v11, %v1334_v9  ;;  %v766_v26 = vmul.f32 %v2080_v2, %v1326_v5  ;;  %v724_v52 = vadd.f32 %v716_v37, %v1883_v7  ;;  %v742_v4 = vmul.f32 %v2056_v11, %v1318_v1 }
  0x71   :  { %660 = vrot.lane.b32.xlu0 %v644_v53, %s1285_s1  ;;  %v718_v22 = vmul.f32 %v1993_v25, %v1414_v29  ;;  %v651_v53 = vadd.f32 %v643_v13, %v625_v36  ;;  %v650_v57 = vadd.f32 %v642_v40, %v624_v58  ;;  %v748_v9 = vadd.f32 %v740_v45, %v722_v41  ;;  %v2217_v45 = vld [vmem:[#allocation2 + $0x80] sm:$0xff] }
  0x72   :  { %v727_v5 = vadd.f32 %v719_v8, %v1883_v7  ;;  %v745_v59 = vmul.f32 %v2056_v11, %v1410_v27  ;;  %1220 = vst.msk [vmem:[%s2663_s2 + $0x208] sm:$0xff] %vm40_vm0, %v2110_v32  ;;  %1221 = vst.msk [vmem:[%s2663_s2 + $0x210] sm:$0xff] %vm40_vm0, %v2110_v32  ;;  %v775_v1 = vadd.f32 %v767_v0, %v749_v46  ;;  %v2165_v18 = vstv %s2084_s20  ;;  %v2219_v8 = vld [vmem:[#allocation2 + $0x58] sm:$0xff] }
  0x73   :  { %1222 = vst.msk [vmem:[%s2663_s2 + $0x218] sm:$0xff] %vm40_vm0, %v2110_v32  ;;  %1223 = vst.msk [vmem:[%s2663_s2 + $0x220] sm:$0xff] %vm40_vm0, %v2110_v32  ;;  %v751_v27 = vadd.f32 %v743_v51, %v725_v47  ;;  %v769_v29 = vmul.f32 %v2080_v2, %v1336_v10  ;;  %v750_v33 = vadd.f32 %v742_v4, %v724_v52  ;;  %v2206_v58 = vstv %s2159_s9 }
  0x74   :  { %666 = vrot.lane.b32.xlu1 %v647_v30, %s1285_s1  ;;  %1224 = vst.msk [vmem:[%s2663_s2 + $0x228] sm:$0xff] %vm40_vm0, %v2110_v32  ;;  %1225 = vst.msk [vmem:[%s2663_s2 + $0x230] sm:$0xff] %vm40_vm0, %v2110_v32  ;;  %v768_v30 = vmul.f32 %v2080_v2, %v1322_v3  ;;  %v726_v63 = vadd.f32 %v718_v22, %v1883_v7  ;;  %v774_v19 = vadd.f32 %v766_v26, %v748_v9  ;;  %v2231_v26 = vld [vmem:[#allocation2 + $0x20] sm:$0xff] }
  0x75   :  { %664 = vrot.lane.b32.xlu0 %v646_v14, %s1285_s1  ;;  %v744_v14 = vmul.f32 %v2056_v11, %v1431_v38  ;;  %v721_v10 = vmul.f32 %v1993_v25, %v1444_v44  ;;  %v720_v3 = vmul.f32 %v1993_v25, %v1456_v55  ;;  %v753_v23 = vadd.f32 %v745_v59, %v727_v5  ;;  %v2287_v59 = vld [vmem:[#allocation2 + $0x38] sm:$0xff] }
  0x76   :  { %v771_v38 = vmul.f32 %v2080_v2, %v1412_v28  ;;  %v777_v42 = vadd.f32 %v769_v29, %v751_v27  ;;  %v770_v24 = vmul.f32 %v2080_v2, %v1433_v39  ;;  %v845_v13 = vmul.f32 %v2165_v18, %v1346_v15  ;;  %1205 = vst.msk [vmem:[%s2663_s2 + $0x1f0] sm:$0x3] %vm49_vm1, %v2007_v31  ;;  %v2293_v29 = vld [vmem:[#allocation2 + $0x60] sm:$0xff] }
  0x77   :  { %v776_v44 = vadd.f32 %v768_v30, %v750_v33  ;;  %v752_v40 = vadd.f32 %v744_v14, %v726_v63  ;;  %v2184_v55 = vstv %s2105_s21  ;;  %v844_v25 = vmul.f32 %v2165_v18, %v2173_v21  ;;  %1226 = vst.msk [vmem:[%s2663_s2 + $0x238] sm:$0x3] %vm49_vm1, %v2110_v32  ;;  %v2295_v30 = vld [vmem:[#allocation2 + $0x30] sm:$0xff] }
  0x78   :  { %670 = vrot.lane.b32.xlu1 %v649_v12, %s1285_s1  ;;  %v747_v12 = vmul.f32 %v2056_v11, %v1447_v49  ;;  %v729_v28 = vadd.f32 %v721_v10, %v1883_v7  ;;  %v728_v39 = vadd.f32 %v720_v3, %v1883_v7  ;;  %v746_v15 = vmul.f32 %v2056_v11, %v1458_v56  ;;  %v2196_v49 = vld [vmem:[#allocation2 + $0x40] sm:$0xff]  ;;  %v966_v10 = vld [vmem:[#allocation2 + $0x8] sm:$0xff] }
  0x79   :  { %668 = vrot.lane.b32.xlu0 %v648_v35, %s1285_s1  ;;  %v779_v43 = vadd.f32 %v771_v38, %v753_v23  ;;  %v773_v35 = vmul.f32 %v2080_v2, %v1449_v50  ;;  %v853_v36 = vadd.f32 %v845_v13, %v2007_v31  ;;  %v871_v37 = vmul.f32 %v2184_v55, %v1348_v16 }
  0x7a   :  { %v847_v41 = vmul.f32 %v2165_v18, %v2188_v34  ;;  %v772_v56 = vmul.f32 %v2080_v2, %v1464_v60  ;;  %v852_v11 = vadd.f32 %v844_v25, %v2007_v31  ;;  %v870_v50 = vmul.f32 %v2184_v55, %v2196_v49  ;;  %v2225_v60 = vld [vmem:[#allocation2 + $0x50] sm:$0xff]  ;;  %v2227_v2 = vld [vmem:[#allocation2 + $0x28] sm:$0xff] }
  0x7b   :  { %v846_v16 = vmul.f32 %v2165_v18, %v2198_v54  ;;  %v778_v46 = vadd.f32 %v770_v24, %v752_v40  ;;  %v755_v0 = vadd.f32 %v747_v12, %v729_v28  ;;  %v754_v47 = vadd.f32 %v746_v15, %v728_v39  ;;  %v2307_v24 = vld [vmem:[#allocation2 + $0xa0] sm:$0xff]  ;;  %v2316_v40 = vld [vmem:[#allocation2 + $0x78] sm:$0xff]  ;;  %v2322_v39 = vld [vmem:[#allocation2 + $0x70] sm:$0xff] }
  0x7c   :  { %674 = vrot.lane.b32.xlu1 %v651_v53, %s1285_s1  ;;  %v897_v51 = vmul.f32 %v2206_v58, %v1350_v17  ;;  %v879_v6 = vadd.f32 %v871_v37, %v853_v36  ;;  %v896_v17 = vmul.f32 %v2206_v58, %v2217_v45  ;;  %v855_v61 = vadd.f32 %v847_v41, %v2007_v31  ;;  %v2281_v53 = vld [vmem:[#allocation2 + $0x68] sm:$0xff] }
  0x7d   :  { %672 = vrot.lane.b32.xlu0 %v650_v57, %s1285_s1  ;;  %v873_v48 = vmul.f32 %v2184_v55, %v2219_v8  ;;  %v878_v7 = vadd.f32 %v870_v50, %v852_v11  ;;  %v854_v52 = vadd.f32 %v846_v16, %v2007_v31  ;;  %v872_v4 = vmul.f32 %v2184_v55, %v2225_v60  ;;  %v992_v36 = vld [vmem:[#allocation2 + $0x48] sm:$0xff] }
  0x7e   :  { %v849_v22 = vmul.f32 %v2165_v18, %v2227_v2  ;;  %v781_v57 = vadd.f32 %v773_v35, %v755_v0  ;;  %v780_v9 = vadd.f32 %v772_v56, %v754_v47  ;;  %v848_v5 = vmul.f32 %v2165_v18, %v2231_v26 }
  0x7f   :  { %v898_v27 = vmul.f32 %v2206_v58, %v2272_v20  ;;  %v905_v33 = vadd.f32 %v897_v51, %v879_v6  ;;  %v881_v63 = vadd.f32 %v873_v48, %v855_v61  ;;  %v875_v14 = vmul.f32 %v2184_v55, %v2281_v53 }
  0x80   :  { %792 = vrot.lane.b32.xlu1 %v775_v1, %s1285_s1  ;;  %v899_v1 = vmul.f32 %v2206_v58, %v2270_v62  ;;  %v2302_v3 = vstv %s2210_s10  ;;  %v904_v23 = vadd.f32 %v896_v17, %v878_v7  ;;  %v880_v38 = vadd.f32 %v872_v4, %v854_v52  ;;  %v1018_v17 = vld [vmem:[#allocation2 + $0x88] sm:$0xff] }
  0x81   :  { %790 = vrot.lane.b32.xlu0 %v774_v19, %s1285_s1  ;;  %v2299_v19 = vld [vmem:[#allocation2 + $0xa8] sm:$0xff]  ;;  %v851_v12 = vmul.f32 %v2165_v18, %v2287_v59  ;;  %v856_v13 = vadd.f32 %v848_v5, %v2007_v31  ;;  %v850_v25 = vmul.f32 %v2165_v18, %v2295_v30  ;;  %v975_v15 = vmul.f32 %v2302_v3, %v966_v10 }
  0x82   :  { %v901_v28 = vmul.f32 %v2206_v58, %v2299_v19  ;;  %v900_v35 = vmul.f32 %v2206_v58, %v2307_v24  ;;  %v2328_v37 = vstv %s2274_s27  ;;  %v974_v41 = vmul.f32 %v2302_v3, %v2173_v21  ;;  %v2342_v21 = vld [vmem:[#allocation2 + $0xb0] sm:$0xff] }
  0x83   :  { %v906_v56 = vadd.f32 %v898_v27, %v880_v38  ;;  %v859_v11 = vadd.f32 %v851_v12, %v2007_v31  ;;  %v877_v50 = vmul.f32 %v2184_v55, %v2316_v40  ;;  %v858_v0 = vadd.f32 %v850_v25, %v2007_v31 }
  0x84   :  { %796 = vrot.lane.b32.xlu1 %v777_v42, %s1285_s1  ;;  %v857_v42 = vadd.f32 %v849_v22, %v2007_v31  ;;  %v876_v47 = vmul.f32 %v2184_v55, %v2322_v39  ;;  %v983_v51 = vadd.f32 %v975_v15, %v2110_v32  ;;  %v1001_v6 = vmul.f32 %v2328_v37, %v992_v36 }
  0x85   :  { %794 = vrot.lane.b32.xlu0 %v776_v44, %s1285_s1  ;;  %v874_v44 = vmul.f32 %v2184_v55, %v2293_v29  ;;  %v1025_v61 = vstv %s2304_s28  ;;  %v982_v48 = vadd.f32 %v974_v41, %v2110_v32  ;;  %v1000_v7 = vmul.f32 %v2328_v37, %v2196_v49 }
  0x86   :  { %v883_v18 = vadd.f32 %v875_v14, %v857_v42  ;;  %v977_v52 = vmul.f32 %v2302_v3, %v2188_v34  ;;  %v902_v4 = vmul.f32 %v2206_v58, %v2342_v21  ;;  %v976_v22 = vmul.f32 %v2302_v3, %v2198_v54 }
  0x87   :  { %v882_v16 = vadd.f32 %v874_v44, %v856_v13  ;;  %v884_v49 = vadd.f32 %v876_v47, %v858_v0  ;;  %v1009_v5 = vadd.f32 %v1001_v6, %v983_v51  ;;  %v1008_v34 = vadd.f32 %v1000_v7, %v982_v48 }
  0x88   :  { %800 = vrot.lane.b32.xlu1 %v779_v43, %s1285_s1  ;;  %v907_v43 = vadd.f32 %v899_v1, %v881_v63  ;;  %v909_v31 = vadd.f32 %v901_v28, %v883_v18  ;;  %v1027_v1 = vmul.f32 %v1025_v61, %v1018_v17  ;;  %v1026_v27 = vmul.f32 %v1025_v61, %v2217_v45 }
  0x89   :  { %798 = vrot.lane.b32.xlu0 %v778_v46, %s1285_s1  ;;  %v2337_v46 = vld [vmem:[#allocation2 + $0xb8] sm:$0xff]  ;;  %v984_v63 = vadd.f32 %v976_v22, %v2110_v32  ;;  %v1002_v54 = vmul.f32 %v2328_v37, %v2225_v60  ;;  %v979_v14 = vmul.f32 %v2302_v3, %v2227_v2  ;;  %v978_v45 = vmul.f32 %v2302_v3, %v2231_v26 }
  0x8a   :  { %v903_v55 = vmul.f32 %v2206_v58, %v2337_v46  ;;  %v1003_v58 = vmul.f32 %v2328_v37, %v2219_v8  ;;  %v1029_v38 = vmul.f32 %v1025_v61, %v2270_v62  ;;  %v1035_v8 = vadd.f32 %v1027_v1, %v1009_v5 }
  0x8b   :  { %v1034_v42 = vadd.f32 %v1026_v27, %v1008_v34  ;;  %v1028_v13 = vmul.f32 %v1025_v61, %v2272_v20  ;;  %v1010_v60 = vadd.f32 %v1002_v54, %v984_v63  ;;  %v987_v44 = vadd.f32 %v979_v14, %v2110_v32 }
  0x8c   :  { %804 = vrot.lane.b32.xlu1 %v781_v57, %s1285_s1  ;;  %v908_v57 = vadd.f32 %v900_v35, %v882_v16  ;;  %v1005_v2 = vmul.f32 %v2328_v37, %v2281_v53  ;;  %v981_v25 = vmul.f32 %v2302_v3, %v2287_v59  ;;  %v986_v26 = vadd.f32 %v978_v45, %v2110_v32 }
  0x8d   :  { %802 = vrot.lane.b32.xlu0 %v780_v9, %s1285_s1  ;;  %v885_v9 = vadd.f32 %v877_v50, %v859_v11  ;;  %v1004_v62 = vmul.f32 %v2328_v37, %v2293_v29  ;;  %v980_v20 = vmul.f32 %v2302_v3, %v2295_v30  ;;  %v1031_v15 = vmul.f32 %v1025_v61, %v2299_v19 }
  0x8e   :  { %v1030_v53 = vmul.f32 %v1025_v61, %v2307_v24  ;;  %v1013_v35 = vadd.f32 %v1005_v2, %v987_v44  ;;  %v989_v59 = vadd.f32 %v981_v25, %v2110_v32  ;;  %v1007_v36 = vmul.f32 %v2328_v37, %v2316_v40 }
  0x8f   :  { %v911_v10 = vadd.f32 %v903_v55, %v885_v9  ;;  %v1012_v29 = vadd.f32 %v1004_v62, %v986_v26  ;;  %v988_v30 = vadd.f32 %v980_v20, %v2110_v32  ;;  %v1006_v19 = vmul.f32 %v2328_v37, %v2322_v39 }
  0x90   :  { %922 = vrot.lane.b32.xlu1 %v905_v33, %s1285_s1  ;;  %v985_v33 = vadd.f32 %v977_v52, %v2110_v32  ;;  %v1039_v40 = vadd.f32 %v1031_v15, %v1013_v35  ;;  %v1033_v41 = vmul.f32 %v1025_v61, %v2337_v46  ;;  %v1032_v32 = vmul.f32 %v1025_v61, %v2342_v21 }
  0x91   :  { %920 = vrot.lane.b32.xlu0 %v904_v23, %s1285_s1  ;;  %v910_v23 = vadd.f32 %v902_v4, %v884_v49  ;;  %v1038_v39 = vadd.f32 %v1030_v53, %v1012_v29  ;;  %v1015_v37 = vadd.f32 %v1007_v36, %v989_v59 }
  0x92   :  { %v1011_v12 = vadd.f32 %v1003_v58, %v985_v33 }
  0x93   :  { %v1041_v50 = vadd.f32 %v1033_v41, %v1015_v37 }
  0x94   :  { %926 = vrot.lane.b32.xlu1 %v907_v43, %s1285_s1  ;;  %v1037_v28 = vadd.f32 %v1029_v38, %v1011_v12  ;;  %v1036_v43 = vadd.f32 %v1028_v13, %v1010_v60 }
  0x95   :  { %924 = vrot.lane.b32.xlu0 %v906_v56, %s1285_s1  ;;  %v1014_v56 = vadd.f32 %v1006_v19, %v988_v30 }
  0x97   :  { %v1040_v16 = vadd.f32 %v1032_v32, %v1014_v56 }
  0x98   :  { %930 = vrot.lane.b32.xlu1 %v909_v31, %s1285_s1 }
  0x99   :  { %928 = vrot.lane.b32.xlu0 %v908_v57, %s1285_s1 }
  0x9c   :  { %934 = vrot.lane.b32.xlu1 %v911_v10, %s1285_s1 }
  0x9d   :  { %932 = vrot.lane.b32.xlu0 %v910_v23, %s1285_s1 }
  0xa0   :  { %1052 = vrot.lane.b32.xlu1 %v1035_v8, %s1285_s1 }
  0xa1   :  { %1050 = vrot.lane.b32.xlu0 %v1034_v42, %s1285_s1 }
  0xa2   :  { %v144_v3 = vpop.permute.xlu1 %143 }
  0xa3   :  { %v140_v24 = vpop.permute.xlu0 %139  ;;  %166 = vst.msk [vmem:[%s2663_s2 + $0x11] sm:$0xff] %vm163_vm2, %v144_v3 }
  0xa4   :  { %164 = vst.msk [vmem:[%s2663_s2 + $0x1] sm:$0xff] %vm163_vm2, %v140_v24  ;;  %1056 = vrot.lane.b32.xlu1 %v1037_v28, %s1285_s1 }
  0xa5   :  { %1054 = vrot.lane.b32.xlu0 %v1036_v43, %s1285_s1 }
  0xa6   :  { %v146_v18 = vpop.permute.xlu1 %145 }
  0xa7   :  { %v142_v11 = vpop.permute.xlu0 %141  ;;  %167 = vst.msk [vmem:[%s2663_s2 + $0x19] sm:$0xff] %vm163_vm2, %v146_v18 }
  0xa8   :  { %165 = vst.msk [vmem:[%s2663_s2 + $0x9] sm:$0xff] %vm163_vm2, %v142_v11  ;;  %1060 = vrot.lane.b32.xlu1 %v1039_v40, %s1285_s1 }
  0xa9   :  { %1058 = vrot.lane.b32.xlu0 %v1038_v39, %s1285_s1 }
  0xaa   :  { %v150_v46 = vpop.permute.xlu1 %149 }
  0xab   :  { %v148_v0 = vpop.permute.xlu0 %147  ;;  %169 = vst.msk [vmem:[%s2663_s2 + $0x29] sm:$0xff] %vm163_vm2, %v150_v46 }
  0xac   :  { %168 = vst.msk [vmem:[%s2663_s2 + $0x21] sm:$0xff] %vm163_vm2, %v148_v0  ;;  %1064 = vrot.lane.b32.xlu1 %v1041_v50, %s1285_s1 }
  0xad   :  { %1062 = vrot.lane.b32.xlu0 %v1040_v16, %s1285_s1 }
  0xae   :  { %v154_v47 = vpop.permute.xlu1 %153 }
  0xaf   :  { %v152_v21 = vpop.permute.xlu0 %151  ;;  %171 = vst.msk [vmem:[%s2663_s2 + $0x39] sm:$0xff] %vm163_vm2, %v154_v47 }
  0xb0   :  { %170 = vst.msk [vmem:[%s2663_s2 + $0x31] sm:$0xff] %vm163_vm2, %v152_v21 }
  0xb2   :  { %v273_v51 = vpop.permute.xlu1 %272 }
  0xb3   :  { %v271_v6 = vpop.permute.xlu0 %270  ;;  %1105 = vst.msk [vmem:[%s2663_s2 + $0x51] sm:$0xff] %vm163_vm2, %v273_v51 }
  0xb4   :  { %1104 = vst.msk [vmem:[%s2663_s2 + $0x49] sm:$0xff] %vm163_vm2, %v271_v6 }
  0xb6   :  { %v277_v17 = vpop.permute.xlu1 %276 }
  0xb7   :  { %v275_v61 = vpop.permute.xlu0 %274  ;;  %1107 = vst.msk [vmem:[%s2663_s2 + $0x61] sm:$0xff] %vm163_vm2, %v277_v17 }
  0xb8   :  { %1106 = vst.msk [vmem:[%s2663_s2 + $0x59] sm:$0xff] %vm163_vm2, %v275_v61 }
  0xba   :  { %v281_v48 = vpop.permute.xlu1 %280 }
  0xbb   :  { %v279_v7 = vpop.permute.xlu0 %278  ;;  %1109 = vst.msk [vmem:[%s2663_s2 + $0x71] sm:$0xff] %vm163_vm2, %v281_v48 }
  0xbc   :  { %1108 = vst.msk [vmem:[%s2663_s2 + $0x69] sm:$0xff] %vm163_vm2, %v279_v7 }
  0xbe   :  { %v285_v52 = vpop.permute.xlu1 %284 }
  0xbf   :  { %v283_v31 = vpop.permute.xlu0 %282  ;;  %1111 = vst.msk [vmem:[%s2663_s2 + $0x81] sm:$0xff] %vm163_vm2, %v285_v52 }
  0xc0   :  { %1110 = vst.msk [vmem:[%s2663_s2 + $0x79] sm:$0xff] %vm163_vm2, %v283_v31 }
  0xc2   :  { %v403_v55 = vpop.permute.xlu1 %402 }
  0xc3   :  { %v401_v4 = vpop.permute.xlu0 %400  ;;  %1126 = vst.msk [vmem:[%s2663_s2 + $0x99] sm:$0xff] %vm163_vm2, %v403_v55 }
  0xc4   :  { %1125 = vst.msk [vmem:[%s2663_s2 + $0x91] sm:$0xff] %vm163_vm2, %v401_v4 }
  0xc6   :  { %v407_v22 = vpop.permute.xlu1 %406 }
  0xc7   :  { %v405_v57 = vpop.permute.xlu0 %404  ;;  %1128 = vst.msk [vmem:[%s2663_s2 + $0xa9] sm:$0xff] %vm163_vm2, %v407_v22 }
  0xc8   :  { %1127 = vst.msk [vmem:[%s2663_s2 + $0xa1] sm:$0xff] %vm163_vm2, %v405_v57 }
  0xca   :  { %v411_v9 = vpop.permute.xlu1 %410 }
  0xcb   :  { %v409_v49 = vpop.permute.xlu0 %408  ;;  %1130 = vst.msk [vmem:[%s2663_s2 + $0xb9] sm:$0xff] %vm163_vm2, %v411_v9 }
  0xcc   :  { %1129 = vst.msk [vmem:[%s2663_s2 + $0xb1] sm:$0xff] %vm163_vm2, %v409_v49 }
  0xce   :  { %v415_v5 = vpop.permute.xlu1 %414 }
  0xcf   :  { %v413_v1 = vpop.permute.xlu0 %412  ;;  %1132 = vst.msk [vmem:[%s2663_s2 + $0xc9] sm:$0xff] %vm163_vm2, %v415_v5 }
  0xd0   :  { %1131 = vst.msk [vmem:[%s2663_s2 + $0xc1] sm:$0xff] %vm163_vm2, %v413_v1 }
  0xd2   :  { %v533_v34 = vpop.permute.xlu1 %532 }
  0xd3   :  { %v531_v27 = vpop.permute.xlu0 %530  ;;  %1147 = vst.msk [vmem:[%s2663_s2 + $0xe1] sm:$0xff] %vm163_vm2, %v533_v34 }
  0xd4   :  { %1146 = vst.msk [vmem:[%s2663_s2 + $0xd9] sm:$0xff] %vm163_vm2, %v531_v27 }
  0xd6   :  { %v537_v33 = vpop.permute.xlu1 %536 }
  0xd7   :  { %v535_v58 = vpop.permute.xlu0 %534  ;;  %1149 = vst.msk [vmem:[%s2663_s2 + $0xf1] sm:$0xff] %vm163_vm2, %v537_v33 }
  0xd8   :  { %1148 = vst.msk [vmem:[%s2663_s2 + $0xe9] sm:$0xff] %vm163_vm2, %v535_v58 }
  0xda   :  { %v541_v63 = vpop.permute.xlu1 %540 }
  0xdb   :  { %v539_v54 = vpop.permute.xlu0 %538  ;;  %1151 = vst.msk [vmem:[%s2663_s2 + $0x101] sm:$0xff] %vm163_vm2, %v541_v63 }
  0xdc   :  { %1150 = vst.msk [vmem:[%s2663_s2 + $0xf9] sm:$0xff] %vm163_vm2, %v539_v54 }
  0xde   :  { %v545_v14 = vpop.permute.xlu1 %544 }
  0xdf   :  { %v543_v10 = vpop.permute.xlu0 %542  ;;  %1153 = vst.msk [vmem:[%s2663_s2 + $0x111] sm:$0xff] %vm163_vm2, %v545_v14 }
  0xe0   :  { %1152 = vst.msk [vmem:[%s2663_s2 + $0x109] sm:$0xff] %vm163_vm2, %v543_v10 }
  0xe2   :  { %v663_v23 = vpop.permute.xlu1 %662 }
  0xe3   :  { %v661_v45 = vpop.permute.xlu0 %660  ;;  %1168 = vst.msk [vmem:[%s2663_s2 + $0x129] sm:$0xff] %vm163_vm2, %v663_v23 }
  0xe4   :  { %1167 = vst.msk [vmem:[%s2663_s2 + $0x121] sm:$0xff] %vm163_vm2, %v661_v45 }
  0xe6   :  { %v667_v38 = vpop.permute.xlu1 %666 }
  0xe7   :  { %v665_v8 = vpop.permute.xlu0 %664  ;;  %1170 = vst.msk [vmem:[%s2663_s2 + $0x139] sm:$0xff] %vm163_vm2, %v667_v38 }
  0xe8   :  { %1169 = vst.msk [vmem:[%s2663_s2 + $0x131] sm:$0xff] %vm163_vm2, %v665_v8 }
  0xea   :  { %v671_v42 = vpop.permute.xlu1 %670 }
  0xeb   :  { %v669_v12 = vpop.permute.xlu0 %668  ;;  %1172 = vst.msk [vmem:[%s2663_s2 + $0x149] sm:$0xff] %vm163_vm2, %v671_v42 }
  0xec   :  { %1171 = vst.msk [vmem:[%s2663_s2 + $0x141] sm:$0xff] %vm163_vm2, %v669_v12 }
  0xee   :  { %v675_v13 = vpop.permute.xlu1 %674 }
  0xef   :  { %v673_v60 = vpop.permute.xlu0 %672  ;;  %1174 = vst.msk [vmem:[%s2663_s2 + $0x159] sm:$0xff] %vm163_vm2, %v675_v13 }
  0xf0   :  { %1173 = vst.msk [vmem:[%s2663_s2 + $0x151] sm:$0xff] %vm163_vm2, %v673_v60 }
  0xf2   :  { %v793_v44 = vpop.permute.xlu1 %792 }
  0xf3   :  { %v791_v2 = vpop.permute.xlu0 %790  ;;  %1189 = vst.msk [vmem:[%s2663_s2 + $0x171] sm:$0xff] %vm163_vm2, %v793_v44 }
  0xf4   :  { %1188 = vst.msk [vmem:[%s2663_s2 + $0x169] sm:$0xff] %vm163_vm2, %v791_v2 }
  0xf6   :  { %v797_v25 = vpop.permute.xlu1 %796 }
  0xf7   :  { %v795_v26 = vpop.permute.xlu0 %794  ;;  %1191 = vst.msk [vmem:[%s2663_s2 + $0x181] sm:$0xff] %vm163_vm2, %v797_v25 }
  0xf8   :  { %1190 = vst.msk [vmem:[%s2663_s2 + $0x179] sm:$0xff] %vm163_vm2, %v795_v26 }
  0xfa   :  { %v801_v62 = vpop.permute.xlu1 %800 }
  0xfb   :  { %v799_v20 = vpop.permute.xlu0 %798  ;;  %1193 = vst.msk [vmem:[%s2663_s2 + $0x191] sm:$0xff] %vm163_vm2, %v801_v62 }
  0xfc   :  { %1192 = vst.msk [vmem:[%s2663_s2 + $0x189] sm:$0xff] %vm163_vm2, %v799_v20 }
  0xfe   :  { %v805_v28 = vpop.permute.xlu1 %804 }
  0xff   :  { %v803_v15 = vpop.permute.xlu0 %802  ;;  %1195 = vst.msk [vmem:[%s2663_s2 + $0x1a1] sm:$0xff] %vm163_vm2, %v805_v28 }
 0x100   :  { %1194 = vst.msk [vmem:[%s2663_s2 + $0x199] sm:$0xff] %vm163_vm2, %v803_v15 }
 0x102   :  { %v923_v53 = vpop.permute.xlu1 %922 }
 0x103   :  { %v921_v43 = vpop.permute.xlu0 %920  ;;  %1210 = vst.msk [vmem:[%s2663_s2 + $0x1b9] sm:$0xff] %vm163_vm2, %v923_v53 }
 0x104   :  { %1209 = vst.msk [vmem:[%s2663_s2 + $0x1b1] sm:$0xff] %vm163_vm2, %v921_v43 }
 0x106   :  { %v927_v35 = vpop.permute.xlu1 %926 }
 0x107   :  { %v925_v59 = vpop.permute.xlu0 %924  ;;  %1212 = vst.msk [vmem:[%s2663_s2 + $0x1c9] sm:$0xff] %vm163_vm2, %v927_v35 }
 0x108   :  { %1211 = vst.msk [vmem:[%s2663_s2 + $0x1c1] sm:$0xff] %vm163_vm2, %v925_v59 }
 0x10a   :  { %v931_v36 = vpop.permute.xlu1 %930 }
 0x10b   :  { %v929_v29 = vpop.permute.xlu0 %928  ;;  %1214 = vst.msk [vmem:[%s2663_s2 + $0x1d9] sm:$0xff] %vm163_vm2, %v931_v36 }
 0x10c   :  { %1213 = vst.msk [vmem:[%s2663_s2 + $0x1d1] sm:$0xff] %vm163_vm2, %v929_v29 }
 0x10e   :  { %v935_v30 = vpop.permute.xlu1 %934 }
 0x10f   :  { %v933_v19 = vpop.permute.xlu0 %932  ;;  %1216 = vst.msk [vmem:[%s2663_s2 + $0x1e9] sm:$0xff] %vm163_vm2, %v935_v30 }
 0x110   :  { %1215 = vst.msk [vmem:[%s2663_s2 + $0x1e1] sm:$0xff] %vm163_vm2, %v933_v19 }
 0x112   :  { %v1053_v3 = vpop.permute.xlu1 %1052 }
 0x113   :  { %v1051_v24 = vpop.permute.xlu0 %1050  ;;  %1231 = vst.msk [vmem:[%s2663_s2 + $0x201] sm:$0xff] %vm163_vm2, %v1053_v3 }
 0x114   :  { %1230 = vst.msk [vmem:[%s2663_s2 + $0x1f9] sm:$0xff] %vm163_vm2, %v1051_v24 }
 0x116   :  { %v1057_v40 = vpop.permute.xlu1 %1056 }
 0x117   :  { %v1055_v41 = vpop.permute.xlu0 %1054  ;;  %1233 = vst.msk [vmem:[%s2663_s2 + $0x211] sm:$0xff] %vm163_vm2, %v1057_v40 }
 0x118   :  { %1232 = vst.msk [vmem:[%s2663_s2 + $0x209] sm:$0xff] %vm163_vm2, %v1055_v41 }
 0x11a   :  { %v1061_v32 = vpop.permute.xlu1 %1060 }
 0x11b   :  { %v1059_v39 = vpop.permute.xlu0 %1058  ;;  %1235 = vst.msk [vmem:[%s2663_s2 + $0x221] sm:$0xff] %vm163_vm2, %v1061_v32 }
 0x11c   :  { %1234 = vst.msk [vmem:[%s2663_s2 + $0x219] sm:$0xff] %vm163_vm2, %v1059_v39 }
 0x11e   :  { %v1065_v37 = vpop.permute.xlu1 %1064 }
 0x11f   :  { %v1063_v56 = vpop.permute.xlu0 %1062  ;;  %1237 = vst.msk [vmem:[%s2663_s2 + $0x231] sm:$0xff] %vm163_vm2, %v1065_v37 }
 0x120   :  { %1236 = vst.msk [vmem:[%s2663_s2 + $0x229] sm:$0xff] %vm163_vm2, %v1063_v56 }
 0x121   :  { %1086 = vsyncpa [#allocation3], 1 }
 0x122   :  { %1087 = vsyncpa [#allocation4], 1 }

// kernel: tpu_custom_call.1
= control target key start
LH: loop header
LB: loop body
LE: loop exit
PB: predicated region body
PF: predicated region fallthrough
CT: control target
= control target key end

     0   :  { %7 = vsyncpa [#allocation3], 0  ;;  %s1584_s0 = inlined_call_operand.vmem [shape: f32[1,3,4356], index: 0, kind: input, shape index: {}]   ;;  %s1585_s1 = inlined_call_operand.vmem [shape: f32[8,4], index: 1, kind: input, shape index: {}]   ;;  %s1586_s2 = inlined_call_operand.hbm [shape: f32[1,8,4356], index: 2, kind: output, shape index: {}]  }
   0x1   :  { %9 = vsyncpa [#allocation3 + $0x1], 0  ;;  %s1122_s9 = smov 0   ;;  %s1124_s10 = smov 0  }
   0x2   :  { %s1126_s11 = smov 0   ;;  %s1128_s12 = smov 0  }
   0x3   :  { %s1130_s13 = smov 0   ;;  %s1132_s14 = smov 0  }
   0x4 LB: > { %s944_s15 = sadd.s32 4294967295, %s1100_s14   ;;  %s945_s16 = sadd.s32 4294967294, %s1100_s14   ;;  %s1100_s14 = sphi %s1132_s14, %s15_s14   ;;  %s1096_s13 = sphi %s1130_s13, %s1615_s13   ;;  %s1092_s12 = sphi %s1128_s12, %s1614_s12   ;;  %s1088_s11 = sphi %s1126_s11, %s1613_s11   ;;  %s1084_s10 = sphi %s1124_s10, %s1612_s10   ;;  %s1080_s9 = sphi %s1122_s9, %s1611_s9  }
   0x5   : > { %s24_s17 = sadd.s32 1, %s1096_s13  ;;  %s85_s18 = sadd.s32 1, %s1088_s11 }
   0x6   : > { %p25_p0 = scmp.ge.s32.totalorder %s24_s17, 2  ;;  %p95_p1 = scmp.ne.s32.totalorder %s1088_s11, %s1084_s10 }
   0x7   : > { %p96_p2 = scmp.eq.s32.totalorder %s944_s15, 1  ;;  %p101_p3 = scmp.ne.s32.totalorder %s1084_s10, %s1080_s9 }
   0x8   : > { %s1617_s17 = smov (%p25_p0, %s24_s17), 0  ;;  %p102_p5 = scmp.eq.s32.totalorder %s945_s16, 1 }
   0x9   : > { %p1162_p4 = por %p96_p2, %p95_p1  ;;  %s81_s20 = ssub.s32 %s1096_s13, %s1617_s17 }
   0xa   : > { %p948_p6 = scmp.ge.s32.totalorder %s1100_s14, 1  ;;  %p83_p7 = scmp.eq.s32.totalorder %s81_s20, 0 }
   0xb   : > { %p1169_p8 = por %p102_p5, %p101_p3  ;;  %p144_p9 = scmp.lt.s32.totalorder %s1100_s14, 3 }
   0xc   : > { %s1175_s22 = scalar_select %p83_p7, %s1088_s11, %s85_s18  }
   0xd   : > { %p145_p10 = pnand %p948_p6, %p144_p9 }
   0xf   : > { %148 = sbr.rel (%p145_p10) target bundleno = 213 (0xd5), region = 28 }
  0x16   : > { %v206_v0 = vld [vmem:[%s1585_s1] sm:$0xff]  ;;  %v1102_v1 = vmov 0   ;;  %v1103_v2 = vmov 1   ;;  %v1104_v3 = vmov 3   ;;  %v1105_v4 = vmov 2   ;;  %s171_s25 = sand.u32 1, %s1084_s10  }
  0x17   : > { %1017 = vset.pattern.permute.xlu0 %v1102_v1  ;;  %1019 = vset.pattern.permute.xlu1 %v1103_v2  ;;  %s1182_s26 = smul.u32 18, %s1092_s12  ;;  %v221_v5 = vlaneseq  ;;  %s1524_s6 = scalar_lea.sflag [#allocation3], %s171_s25 }
  0x18   : > { %209 = vperm.xlu0 %1017, %v206_v0   ;;  %424 = vperm.xlu1 %1019, %v206_v0   ;;  %s958_s4 = smul.u32 144, %s171_s25 }
  0x19   : > { %p181_p11 = scmp.lt.s32.totalorder %s1182_s26, 34  ;;  %v1186_v6 = vshrl.u32 %v221_v5, 7  ;;  %s854_s7 = ssub.s32 (%p1162_p4), 35, %s1182_s26 }
  0x1a   : > { %s1502_s5 = scalar_lea.vmem [#allocation2], %s958_s4  ;;  %p855_p12 = scmp.lt.s32.totalorder (%p1162_p4), %s854_s7, 18 }
  0x1b   : > { %s182_s27 = scalar_select %p181_p11, %s1182_s26, 34  ;;  %v223_v7 = vsub.s32 0, %v1186_v6  ;;  %v227_v8 = vsub.s32 4, %v1186_v6  ;;  %v1200_v12 = vsub.s32 1, %v1186_v6  ;;  %v1207_v15 = vsub.s32 5, %v1186_v6 }
  0x1c   : > { %1018 = vset.pattern.permute.xlu0 %v1104_v3  ;;  %1020 = vset.pattern.permute.xlu1 %v1105_v4  ;;  %v1210_v16 = vsub.s32 2, %v1186_v6 }
  0x1d   : > { %402 = vperm.xlu0 %1018, %v206_v0   ;;  %626 = vperm.xlu1 %1020, %v206_v0   ;;  %s949_s28 = sshll.u32 %s182_s27, 2 }
  0x1e   : > { %s186_s3 = scalar_lea.vmem %s1584_s0, %s949_s28 }
  0x1f   : > { %v1193_v9 = vld [vmem:[%s186_s3] sm:$0x77]  ;;  %v1195_v10 = vld [vmem:[%s186_s3 + $0x8] sm:$0x77]  ;;  %v1197_v11 = vld [vmem:[%s186_s3 + $0x10] sm:$0x77] }
  0x20   : > { %v1202_v13 = vld [vmem:[%s186_s3 + $0x18] sm:$0x77]  ;;  %v1204_v14 = vld [vmem:[%s186_s3 + $0x20] sm:$0x77]  ;;  %v1212_v17 = vld [vmem:[%s186_s3 + $0x28] sm:$0x77]  ;;  %v224_v19 = vrot.slane %v1193_v9, %v223_v7  ;;  %v228_v22 = vrot.slane %v1193_v9, %v227_v8  ;;  %v232_v23 = vrot.slane %v1195_v10, %v223_v7  ;;  %v236_v24 = vrot.slane %v1195_v10, %v227_v8 }
  0x21   : > { %1021 = vset.pattern.permute.xlu0 %v1105_v4  ;;  %v1214_v18 = vld [vmem:[%s186_s3 + $0x30] sm:$0x77]  ;;  %v1217_v20 = vld [vmem:[%s186_s3 + $0x38] sm:$0x77]  ;;  %v1219_v21 = vld [vmem:[%s186_s3 + $0x40] sm:$0x77]  ;;  %v240_v25 = vrot.slane %v1197_v11, %v223_v7  ;;  %v244_v26 = vrot.slane %v1197_v11, %v227_v8  ;;  %v248_v27 = vrot.slane %v1202_v13, %v223_v7  ;;  %v252_v28 = vrot.slane %v1202_v13, %v227_v8 }
  0x22   : > { %v256_v29 = vrot.slane %v1204_v14, %v223_v7  ;;  %v260_v30 = vrot.slane %v1204_v14, %v227_v8  ;;  %v264_v31 = vrot.slane %v1212_v17, %v223_v7  ;;  %v268_v32 = vrot.slane %v1212_v17, %v227_v8 }
  0x23   : > { %v272_v33 = vrot.slane %v1214_v18, %v223_v7  ;;  %v276_v34 = vrot.slane %v1214_v18, %v227_v8  ;;  %v280_v35 = vrot.slane %v1217_v20, %v223_v7  ;;  %v284_v36 = vrot.slane %v1217_v20, %v227_v8 }
  0x24   : > { %v288_v37 = vrot.slane %v1219_v21, %v223_v7  ;;  %v292_v38 = vrot.slane %v1219_v21, %v227_v8  ;;  %v1238_v39 = vrot.slane %v224_v19, %v223_v7  ;;  %v1240_v40 = vrot.slane %v228_v22, %v223_v7 }
  0x25   : > { %v1242_v41 = vrot.slane %v232_v23, %v223_v7  ;;  %v1244_v42 = vrot.slane %v236_v24, %v223_v7  ;;  %v1246_v43 = vrot.slane %v240_v25, %v223_v7  ;;  %v1248_v44 = vrot.slane %v244_v26, %v223_v7 }
  0x26   : > { %v1250_v45 = vrot.slane %v248_v27, %v223_v7  ;;  %v1252_v46 = vrot.slane %v252_v28, %v223_v7  ;;  %v1254_v47 = vrot.slane %v256_v29, %v223_v7  ;;  %v1256_v48 = vrot.slane %v260_v30, %v223_v7 }
  0x27   : > { %v1258_v49 = vrot.slane %v264_v31, %v223_v7  ;;  %v1260_v50 = vrot.slane %v268_v32, %v223_v7  ;;  %v1262_v51 = vrot.slane %v272_v33, %v223_v7  ;;  %v1264_v52 = vrot.slane %v276_v34, %v223_v7 }
  0x28   : > { %v1266_v53 = vrot.slane %v280_v35, %v223_v7  ;;  %v1268_v54 = vrot.slane %v284_v36, %v223_v7  ;;  %v1270_v55 = vrot.slane %v288_v37, %v223_v7  ;;  %v1272_v56 = vrot.slane %v292_v38, %v223_v7 }
  0x29   : > { %v430_v57 = vrot.slane %v1193_v9, %v1200_v12  ;;  %v434_v58 = vrot.slane %v1193_v9, %v1207_v15  ;;  %v438_v59 = vrot.slane %v1195_v10, %v1200_v12  ;;  %v442_v60 = vrot.slane %v1195_v10, %v1207_v15 }
  0x2a   : > { %v446_v61 = vrot.slane %v1197_v11, %v1200_v12  ;;  %v450_v62 = vrot.slane %v1197_v11, %v1207_v15  ;;  %v454_v63 = vrot.slane %v1202_v13, %v1200_v12  ;;  %v458_v0 = vrot.slane %v1202_v13, %v1207_v15 }
  0x2b   : > { %v462_v1 = vrot.slane %v1204_v14, %v1200_v12  ;;  %v466_v2 = vrot.slane %v1204_v14, %v1207_v15  ;;  %v470_v3 = vrot.slane %v1212_v17, %v1200_v12  ;;  %v474_v4 = vrot.slane %v1212_v17, %v1207_v15 }
  0x2c   : > { %v478_v5 = vrot.slane %v1214_v18, %v1200_v12  ;;  %v482_v7 = vrot.slane %v1214_v18, %v1207_v15  ;;  %v486_v8 = vrot.slane %v1217_v20, %v1200_v12  ;;  %v490_v19 = vrot.slane %v1217_v20, %v1207_v15 }
  0x2d   : > { %v494_v22 = vrot.slane %v1219_v21, %v1200_v12  ;;  %v498_v23 = vrot.slane %v1219_v21, %v1207_v15  ;;  %v1311_v24 = vrot.slane %v430_v57, %v1200_v12  ;;  %v1314_v25 = vrot.slane %v434_v58, %v1200_v12 }
  0x2e   : > { %v1317_v26 = vrot.slane %v438_v59, %v1200_v12  ;;  %v1320_v27 = vrot.slane %v442_v60, %v1200_v12  ;;  %v1323_v28 = vrot.slane %v446_v61, %v1200_v12  ;;  %v1326_v29 = vrot.slane %v450_v62, %v1200_v12 }
  0x2f   : > { %v635_v15 = vsub.s32 6, %v1186_v6  ;;  %v1330_v30 = vrot.slane %v454_v63, %v1200_v12  ;;  %v1333_v31 = vrot.slane %v458_v0, %v1200_v12  ;;  %v1336_v32 = vrot.slane %v462_v1, %v1200_v12 }
  0x30   : > { %v1339_v33 = vrot.slane %v466_v2, %v1200_v12  ;;  %v1342_v34 = vrot.slane %v470_v3, %v1200_v12  ;;  %v1345_v35 = vrot.slane %v474_v4, %v1200_v12  ;;  %v1348_v6 = vrot.slane %v478_v5, %v1200_v12 }
  0x31   : > { %v1351_v36 = vrot.slane %v482_v7, %v1200_v12  ;;  %v1354_v37 = vrot.slane %v486_v8, %v1200_v12  ;;  %v1357_v38 = vrot.slane %v490_v19, %v1200_v12  ;;  %v1360_v57 = vrot.slane %v494_v22, %v1200_v12 }
  0x32   : > { %v1363_v58 = vrot.slane %v498_v23, %v1200_v12  ;;  %v632_v59 = vrot.slane %v1193_v9, %v1210_v16  ;;  %v636_v60 = vrot.slane %v1193_v9, %v635_v15  ;;  %v640_v61 = vrot.slane %v1195_v10, %v1210_v16 }
  0x33   : > { %v648_v62 = vrot.slane %v1197_v11, %v1210_v16  ;;  %v644_v63 = vrot.slane %v1195_v10, %v635_v15  ;;  %v652_v0 = vrot.slane %v1197_v11, %v635_v15  ;;  %v656_v1 = vrot.slane %v1202_v13, %v1210_v16 }
  0x34   : > { %v664_v12 = vrot.slane %v1204_v14, %v1210_v16  ;;  %v660_v2 = vrot.slane %v1202_v13, %v635_v15  ;;  %v668_v9 = vrot.slane %v1204_v14, %v635_v15  ;;  %v672_v3 = vrot.slane %v1212_v17, %v1210_v16 }
  0x35   : > { %v680_v4 = vrot.slane %v1214_v18, %v1210_v16  ;;  %v676_v10 = vrot.slane %v1212_v17, %v635_v15  ;;  %v684_v11 = vrot.slane %v1214_v18, %v635_v15  ;;  %v688_v5 = vrot.slane %v1217_v20, %v1210_v16 }
  0x36   : > { %v692_v7 = vrot.slane %v1217_v20, %v635_v15  ;;  %v696_v13 = vrot.slane %v1219_v21, %v1210_v16  ;;  %v700_v14 = vrot.slane %v1219_v21, %v635_v15  ;;  %v1393_v8 = vrot.slane %v632_v59, %v1210_v16 }
  0x37   : > { %v1396_v19 = vrot.slane %v636_v60, %v1210_v16  ;;  %v1399_v17 = vrot.slane %v640_v61, %v1210_v16  ;;  %v1402_v18 = vrot.slane %v644_v63, %v1210_v16  ;;  %v1405_v22 = vrot.slane %v648_v62, %v1210_v16 }
  0x38   : > { %v1408_v20 = vrot.slane %v652_v0, %v1210_v16  ;;  %v1411_v21 = vrot.slane %v656_v1, %v1210_v16  ;;  %v1414_v23 = vrot.slane %v660_v2, %v1210_v16  ;;  %v1417_v15 = vrot.slane %v664_v12, %v1210_v16 }
  0x39   : > { %v1420_v59 = vrot.slane %v668_v9, %v1210_v16  ;;  %v1423_v60 = vrot.slane %v672_v3, %v1210_v16  ;;  %v1426_v61 = vrot.slane %v676_v10, %v1210_v16  ;;  %v1429_v62 = vrot.slane %v680_v4, %v1210_v16 }
  0x3a   : > { %1589 = vst [vmem:[#allocation5_spill] sm:$0xff] %v1414_v23  ;;  %1590 = vst [vmem:[#allocation6_spill] sm:$0xff] %v1417_v15  ;;  %v1432_v63 = vrot.slane %v684_v11, %v1210_v16  ;;  %v1435_v1 = vrot.slane %v688_v5, %v1210_v16  ;;  %v1438_v12 = vrot.slane %v692_v7, %v1210_v16 }
  0x3b   : > { %1591 = vst [vmem:[#allocation7_spill] sm:$0xff] %v1420_v59  ;;  %1592 = vst [vmem:[#allocation8_spill] sm:$0xff] %v1423_v60  ;;  %v1441_v2 = vrot.slane %v696_v13, %v1210_v16  ;;  %v1444_v9 = vrot.slane %v700_v14, %v1210_v16 }
  0x3c   : > { %1593 = vst [vmem:[#allocation9_spill] sm:$0xff] %v1426_v61  ;;  %1594 = vst [vmem:[#allocation10_spill] sm:$0xff] %v1429_v62 }
  0x3d   : > { %1595 = vst [vmem:[#allocation11_spill] sm:$0xff] %v1432_v63  ;;  %1596 = vst [vmem:[#allocation12_spill] sm:$0xff] %v1435_v1 }
  0x3e   : > { %1597 = vst [vmem:[#allocation13_spill] sm:$0xff] %v1438_v12  ;;  %1598 = vst [vmem:[#allocation14_spill] sm:$0xff] %v1441_v2 }
  0x3f   : > { %1599 = vst [vmem:[#allocation15_spill] sm:$0xff] %v1444_v9 }
  0x97   : > { %v210_v0 = vpop.permute.xlu0 %209  ;;  %v425_v63 = vpop.permute.xlu1 %424 }
  0x98   : > { %v383_v3 = vmul.f32 %v1238_v39, %v210_v0  ;;  %v384_v4 = vmul.f32 %v1240_v40, %v210_v0  ;;  %v385_v10 = vmul.f32 %v1242_v41, %v210_v0  ;;  %v386_v11 = vmul.f32 %v1244_v42, %v210_v0 }
  0x99   : > { %v387_v5 = vmul.f32 %v1246_v43, %v210_v0  ;;  %v388_v7 = vmul.f32 %v1248_v44, %v210_v0  ;;  %v389_v12 = vmul.f32 %v1250_v45, %v210_v0  ;;  %v390_v13 = vmul.f32 %v1252_v46, %v210_v0 }
  0x9a   : > { %v391_v16 = vmul.f32 %v1254_v47, %v210_v0  ;;  %v392_v14 = vmul.f32 %v1256_v48, %v210_v0  ;;  %v393_v39 = vmul.f32 %v1258_v49, %v210_v0  ;;  %v394_v40 = vmul.f32 %v1260_v50, %v210_v0 }
  0x9b   : > { %v395_v41 = vmul.f32 %v1262_v51, %v210_v0  ;;  %v396_v42 = vmul.f32 %v1264_v52, %v210_v0  ;;  %v397_v43 = vmul.f32 %v1266_v53, %v210_v0  ;;  %v398_v44 = vmul.f32 %v1268_v54, %v210_v0 }
  0x9c   : > { %v403_v9 = vpop.permute.xlu0 %402  ;;  %v399_v45 = vmul.f32 %v1270_v55, %v210_v0  ;;  %v400_v46 = vmul.f32 %v1272_v56, %v210_v0  ;;  %v589_v47 = vmul.f32 %v1311_v24, %v425_v63  ;;  %v590_v48 = vmul.f32 %v1314_v25, %v425_v63 }
  0x9d   : > { %v405_v49 = vadd.f32 %v403_v9, %v383_v3  ;;  %v406_v2 = vadd.f32 %v403_v9, %v384_v4  ;;  %v407_v50 = vadd.f32 %v403_v9, %v385_v10  ;;  %v408_v1 = vadd.f32 %v403_v9, %v386_v11 }
  0x9e   : > { %v409_v51 = vadd.f32 %v403_v9, %v387_v5  ;;  %v410_v62 = vadd.f32 %v403_v9, %v388_v7  ;;  %v411_v52 = vadd.f32 %v403_v9, %v389_v12  ;;  %v412_v61 = vadd.f32 %v403_v9, %v390_v13 }
  0x9f   : > { %v413_v53 = vadd.f32 %v403_v9, %v391_v16  ;;  %v414_v60 = vadd.f32 %v403_v9, %v392_v14  ;;  %v415_v54 = vadd.f32 %v403_v9, %v393_v39  ;;  %v416_v59 = vadd.f32 %v403_v9, %v394_v40 }
  0xa0   : > { %v417_v15 = vadd.f32 %v403_v9, %v395_v41  ;;  %v418_v55 = vadd.f32 %v403_v9, %v396_v42  ;;  %v419_v23 = vadd.f32 %v403_v9, %v397_v43  ;;  %v420_v56 = vadd.f32 %v403_v9, %v398_v44 }
  0xa1   : > { %v421_v0 = vadd.f32 %v403_v9, %v399_v45  ;;  %v422_v24 = vadd.f32 %v403_v9, %v400_v46  ;;  %v591_v25 = vmul.f32 %v1317_v26, %v425_v63  ;;  %v592_v3 = vmul.f32 %v1320_v27, %v425_v63  ;;  %v1601_v46 = vld [vmem:[#allocation6_spill] sm:$0xff] }
  0xa2   : > { %v593_v4 = vmul.f32 %v1323_v28, %v425_v63  ;;  %v594_v10 = vmul.f32 %v1326_v29, %v425_v63  ;;  %v595_v12 = vmul.f32 %v1330_v30, %v425_v63  ;;  %v596_v11 = vmul.f32 %v1333_v31, %v425_v63 }
  0xa3   : > { %v597_v5 = vmul.f32 %v1336_v32, %v425_v63  ;;  %v598_v7 = vmul.f32 %v1339_v33, %v425_v63  ;;  %v599_v13 = vmul.f32 %v1342_v34, %v425_v63  ;;  %v600_v9 = vmul.f32 %v1345_v35, %v425_v63 }
  0xa4   : > { %v601_v26 = vmul.f32 %v1348_v6, %v425_v63  ;;  %v602_v27 = vmul.f32 %v1351_v36, %v425_v63  ;;  %v603_v28 = vmul.f32 %v1354_v37, %v425_v63  ;;  %v604_v29 = vmul.f32 %v1357_v38, %v425_v63  ;;  %v627_v36 = vpop.permute.xlu1 %626 }
  0xa5   : > { %v605_v30 = vmul.f32 %v1360_v57, %v425_v63  ;;  %v606_v31 = vmul.f32 %v1363_v58, %v425_v63  ;;  %v607_v16 = vadd.f32 %v589_v47, %v405_v49  ;;  %v608_v32 = vadd.f32 %v590_v48, %v406_v2  ;;  %v1602_v48 = vld [vmem:[#allocation7_spill] sm:$0xff] }
  0xa6   : > { %v609_v14 = vadd.f32 %v591_v25, %v407_v50  ;;  %v610_v33 = vadd.f32 %v592_v3, %v408_v1  ;;  %v611_v34 = vadd.f32 %v593_v4, %v409_v51  ;;  %v612_v39 = vadd.f32 %v594_v10, %v410_v62  ;;  %v1603_v50 = vld [vmem:[#allocation8_spill] sm:$0xff]  ;;  %v1604_v51 = vld [vmem:[#allocation9_spill] sm:$0xff] }
  0xa7   : > { %v613_v35 = vadd.f32 %v595_v12, %v411_v52  ;;  %v614_v40 = vadd.f32 %v596_v11, %v412_v61  ;;  %v615_v6 = vadd.f32 %v597_v5, %v413_v53  ;;  %v616_v41 = vadd.f32 %v598_v7, %v414_v60  ;;  %v1605_v52 = vld [vmem:[#allocation10_spill] sm:$0xff]  ;;  %v1606_v53 = vld [vmem:[#allocation11_spill] sm:$0xff] }
  0xa8   : > { %v617_v42 = vadd.f32 %v599_v13, %v415_v54  ;;  %v618_v37 = vadd.f32 %v600_v9, %v416_v59  ;;  %v619_v43 = vadd.f32 %v601_v26, %v417_v15  ;;  %v620_v38 = vadd.f32 %v602_v27, %v418_v55  ;;  %v1607_v54 = vld [vmem:[#allocation12_spill] sm:$0xff]  ;;  %v1608_v55 = vld [vmem:[#allocation13_spill] sm:$0xff] }
  0xa9   : > { %v621_v44 = vadd.f32 %v603_v28, %v419_v23  ;;  %v622_v57 = vadd.f32 %v604_v29, %v420_v56  ;;  %v623_v45 = vadd.f32 %v605_v30, %v421_v0  ;;  %v624_v58 = vadd.f32 %v606_v31, %v422_v24  ;;  %v1600_v23 = vld [vmem:[#allocation5_spill] sm:$0xff]  ;;  %v1609_v56 = vld [vmem:[#allocation14_spill] sm:$0xff]  ;;  %v1610_v0 = vld [vmem:[#allocation15_spill] sm:$0xff] }
  0xaa   : > { %v791_v63 = vmul.f32 %v1393_v8, %v627_v36  ;;  %v792_v1 = vmul.f32 %v1396_v19, %v627_v36  ;;  %v793_v62 = vmul.f32 %v1399_v17, %v627_v36  ;;  %v794_v61 = vmul.f32 %v1402_v18, %v627_v36 }
  0xab   : > { %v795_v60 = vmul.f32 %v1405_v22, %v627_v36  ;;  %v796_v59 = vmul.f32 %v1408_v20, %v627_v36  ;;  %v797_v15 = vmul.f32 %v1411_v21, %v627_v36  ;;  %v798_v2 = vmul.f32 %v1600_v23, %v627_v36 }
  0xac   : > { %v799_v47 = vmul.f32 %v1601_v46, %v627_v36  ;;  %v800_v49 = vmul.f32 %v1602_v48, %v627_v36  ;;  %v801_v8 = vmul.f32 %v1603_v50, %v627_v36  ;;  %v802_v19 = vmul.f32 %v1604_v51, %v627_v36 }
  0xad   : > { %v803_v17 = vmul.f32 %v1605_v52, %v627_v36  ;;  %v804_v18 = vmul.f32 %v1606_v53, %v627_v36  ;;  %v805_v22 = vmul.f32 %v1607_v54, %v627_v36  ;;  %v806_v20 = vmul.f32 %v1608_v55, %v627_v36 }
  0xae   : > { %v807_v21 = vmul.f32 %v1609_v56, %v627_v36  ;;  %v808_v24 = vmul.f32 %v1610_v0, %v627_v36  ;;  %v809_v25 = vadd.f32 %v791_v63, %v607_v16  ;;  %v810_v3 = vadd.f32 %v792_v1, %v608_v32 }
  0xaf   : > { %v811_v4 = vadd.f32 %v793_v62, %v609_v14  ;;  %v812_v10 = vadd.f32 %v794_v61, %v610_v33  ;;  %v813_v12 = vadd.f32 %v795_v60, %v611_v34  ;;  %v814_v11 = vadd.f32 %v796_v59, %v612_v39 }
  0xb0   : > { %v815_v5 = vadd.f32 %v797_v15, %v613_v35  ;;  %v816_v7 = vadd.f32 %v798_v2, %v614_v40  ;;  %v817_v13 = vadd.f32 %v799_v47, %v615_v6  ;;  %v818_v9 = vadd.f32 %v800_v49, %v616_v41  ;;  %827 = vst [vmem:[%s1502_s5] sm:$0xff] %v809_v25 }
  0xb1   : > { %828 = vst [vmem:[%s1502_s5 + $0x8] sm:$0xff] %v810_v3  ;;  %v819_v26 = vadd.f32 %v801_v8, %v617_v42  ;;  %v820_v27 = vadd.f32 %v802_v19, %v618_v37  ;;  %v821_v28 = vadd.f32 %v803_v17, %v619_v43  ;;  %v822_v29 = vadd.f32 %v804_v18, %v620_v38 }
  0xb2   : > { %829 = vst [vmem:[%s1502_s5 + $0x10] sm:$0xff] %v811_v4  ;;  %830 = vst [vmem:[%s1502_s5 + $0x18] sm:$0xff] %v812_v10  ;;  %v823_v30 = vadd.f32 %v805_v22, %v621_v44  ;;  %v824_v31 = vadd.f32 %v806_v20, %v622_v57  ;;  %v825_v16 = vadd.f32 %v807_v21, %v623_v45 }
  0xb3   : > { %831 = vst [vmem:[%s1502_s5 + $0x20] sm:$0xff] %v813_v12  ;;  %832 = vst [vmem:[%s1502_s5 + $0x28] sm:$0xff] %v814_v11  ;;  %v826_v32 = vadd.f32 %v808_v24, %v624_v58  ;;  %852 = sbr.rel (!%p1162_p4) target bundleno = 213 (0xd5), region = 32 }
  0xb4   : > { %833 = vst [vmem:[%s1502_s5 + $0x30] sm:$0xff] %v815_v5  ;;  %834 = vst [vmem:[%s1502_s5 + $0x38] sm:$0xff] %v816_v7 }
  0xb5   : > { %835 = vst [vmem:[%s1502_s5 + $0x40] sm:$0xff] %v817_v13  ;;  %836 = vst [vmem:[%s1502_s5 + $0x48] sm:$0xff] %v818_v9 }
  0xb6   : > { %837 = vst [vmem:[%s1502_s5 + $0x50] sm:$0xff] %v819_v26  ;;  %838 = vst [vmem:[%s1502_s5 + $0x58] sm:$0xff] %v820_v27 }
  0xb7   : > { %839 = vst [vmem:[%s1502_s5 + $0x60] sm:$0xff] %v821_v28  ;;  %840 = vst [vmem:[%s1502_s5 + $0x68] sm:$0xff] %v822_v29 }
  0xb8   : > { %841 = vst [vmem:[%s1502_s5 + $0x70] sm:$0xff] %v823_v30  ;;  %842 = vst [vmem:[%s1502_s5 + $0x78] sm:$0xff] %v824_v31 }
  0xb9   : > { %843 = vst [vmem:[%s1502_s5 + $0x80] sm:$0xff] %v825_v16  ;;  %844 = vst [vmem:[%s1502_s5 + $0x88] sm:$0xff] %v826_v32 }
  0xba   : > { %s1619_s7 = smov (!%p855_p12, %s854_s7), 18 }
  0xbb   : > { %s1529_s8 = sshll.u32 %s1619_s7, 7 }
  0xbc   : > { %s859_s15 = ssub.s32 2304, %s1529_s8 }
  0xbd   : > { %860 = vsyncadd %s1524_s6, %s859_s15  ;;  %p951_p13 = scmp.ne.s32.totalorder %s1529_s8, 0  ;;  %s957_s16 = smul.u32 2304, %s1092_s12 }
  0xbe   : > { %s868_s18 = sshll.u32 %s1502_s5, 4  ;;  %s1106_s25 = smov [#allocation2]   ;;  %s869_s18 = int_to_ptr.vmem [resolvable:$true] %s868_s18 }
  0xbf   : > { %s1539_s23 = scalar_lea.hbm %s1586_s2, %s957_s16  ;;  %s1022_s24 = scalar_lea.vmem %s869_s18, %s1529_s8 }
  0xc0   : > { %p1023_p0 = scmp.ne.s32.totalorder %s869_s18, %s1022_s24  ;;  %s1026_s26 = sshll.u32 %s1106_s25, 4  ;;  %s1027_s26 = int_to_ptr.vmem [resolvable:$false] %s1026_s26 }
  0xc1   : > { %s1028_s27 = scalar_lea.vmem %s1027_s26, 4608  ;;  %p1029_p3 = scmp.lt.s32.totalorder %s869_s18, %s1027_s26 }
  0xc2   : > { %p1024_p1 = pnand %p1023_p0, %p951_p13  ;;  %p1030_p4 = scmp.lt.s32.totalorder %s1028_s27, %s1022_s24 }
  0xc4   : > { %p1025_p2 = pneg %p1024_p1  ;;  %p1031_p5 = por %p1030_p4, %p1029_p3 }
  0xc6   : > { %p1032_p6 = pnand %p1031_p5, %p1025_p2 }
  0xc8   : > { %1035 = shalt.err (!%p1032_p6)
}
  0xc9   : > { %s1036_s12 = scalar_lea.hbm %s1539_s23, %s1529_s8  ;;  %s1040_s30 = scalar_lea.hbm %s1586_s2, 4480 }
  0xca   : > { %p1037_p7 = scmp.ne.s32.totalorder %s1539_s23, %s1036_s12  ;;  %p1041_p11 = scmp.lt.u32.totalorder %s1539_s23, %s1586_s2 }
  0xcb   : > { %p1042_p12 = scmp.lt.u32.totalorder %s1040_s30, %s1036_s12  ;;  %p1044_p1 = scmp.lt.u32.totalorder %s1036_s12, %s1539_s23 }
  0xcc   : > { %p1038_p9 = pnand %p1037_p7, %p951_p13 }
  0xcd   : > { %p1043_p0 = por %p1042_p12, %p1041_p11 }
  0xce   : > { %p1039_p10 = pneg %p1038_p9 }
  0xcf   : > { %p1045_p2 = por %p1044_p1, %p1043_p0 }
  0xd1   : > { %p1046_p3 = pnand %p1045_p2, %p1039_p10 }
  0xd3   : > { %1049 = shalt.err (!%p1046_p3)
}
  0xd4   : > { %871 = dma.vmem_to_hbm [thread:$0]  (%p951_p13), %s869_s18, %s1529_s8, %s1539_s23, %s1524_s6  }
  0xd5 PF: > { %p964_p4 = scmp.ge.s32.totalorder %s1100_s14, 2  ;;  %s880_s5 = sand.u32 1, %s1080_s9  }
  0xd6   : > { %s881_s7 = scalar_lea.sflag [#allocation3], %s880_s5 }
  0xd7   : > { %p961_p5 = pnand %p964_p4, %p1169_p8 }
  0xd9   : > { %1075 = dma.done.wait (!%p961_p5), %s881_s7, 2304  }
  0xda   : > { %1077 = vsyncadd (!%p961_p5), %s881_s7, 4294964992  ;;  %s15_s14 = sadd.s32 1, %s1100_s14   ;;  %s1611_s9 = smov %s1084_s10 }
  0xdb   : > { %p12_p6 = scmp.ge.s32.totalorder %s15_s14, 4   ;;  %s1612_s10 = smov %s1088_s11 }
  0xdc   : > { %s1613_s11 = smov %s1175_s22  ;;  %s1614_s12 = smov %s1096_s13 }
  0xdd   : > { %s1615_s13 = smov %s1617_s17  ;;  %14 = sbr.rel (!%p12_p6) target bundleno = 4 (0x4), region = 63 }
  0xe4   :  { %886 = vsyncpa [#allocation3], 1 }
  0xe5   :  { %888 = vsyncpa [#allocation3 + $0x1], 1 }

</bundles_post_ra>
